<compile_context>
chip_gen: v7x
topology: tpu7x:2x2x1
jax: 0.10.0
libtpu: 0.0.40
codegen_flags: <defaults>
</compile_context>

<pallas_src>
import math
import jax
import jax.numpy as jnp
from jax.experimental import pallas as pl
from jax.experimental.pallas import tpu as pltpu

# ---- config (stand-in for get_config(); deterministic, small) ----
N_EMBD = 32          # n_embd
N_HEAD = 4           # n_head
MLP_FACTOR = 4       # mlp_size_factor
BIAS = True          # bias
SEQ = 8              # T (<= block_size)
BATCH = 2            # B

LN_EPS = 1e-5
NEG_INF = -1e30      # large finite negative (NaN-safe if mask is generalized)


def _layernorm(x, w, b):
    mu = jnp.mean(x, axis=-1, keepdims=True)
    var = jnp.mean((x - mu) ** 2, axis=-1, keepdims=True)
    return (x - mu) * jax.lax.rsqrt(var + LN_EPS) * w + b


def _gelu_exact(x):
    # nn.GELU() default (approximate='none'): exact erf-based GELU, kept in f32
    # to match the PyTorch reference semantics.
    return 0.5 * x * (1.0 + jax.lax.erf(x * 0.7071067811865476))


def block_kernel(x_ref,
                 ln1w_ref, ln1b_ref,
                 wq_ref, wk_ref, wv_ref,
                 bq_ref, bk_ref, bv_ref,
                 wproj_ref, bproj_ref,
                 ln2w_ref, ln2b_ref,
                 wfc_ref, bfc_ref,
                 wpr_ref, bpr_ref,
                 o_ref):
    B, T, C = x_ref.shape
    BT = B * T
    NH, _, HD = wq_ref.shape

    # All tokens in one slab: (B*T, C).  Leading-dim merge only (layout-free).
    x = x_ref[...].reshape(BT, C)

    # ---------------- attention branch: x = x + attn(ln_1(x)) ----------------
    xn = _layernorm(x, ln1w_ref[...], ln1b_ref[...])      # f32
    xnb = xn.astype(jnp.bfloat16)                          # bf16 into the MXU

    row = jax.lax.broadcasted_iota(jnp.int32, (B, T, T), 1)
    col = jax.lax.broadcasted_iota(jnp.int32, (B, T, T), 2)
    causal = col <= row

    att = jnp.zeros((BT, C), jnp.float32)
    for h in range(NH):                                    # static -> unrolled
        # Per-head projections over M = B*T rows; weights were pre-split per
        # head in the wrapper (1/sqrt(hd) already folded into wq/bq), so no
        # in-kernel lane slicing is needed.
        qh = jnp.dot(xnb, wq_ref[h], preferred_element_type=jnp.float32) + bq_ref[h]
        kh = jnp.dot(xnb, wk_ref[h], preferred_element_type=jnp.float32) + bk_ref[h]
        vh = jnp.dot(xnb, wv_ref[h], preferred_element_type=jnp.float32) + bv_ref[h]

        # (B*T, HD) -> (B, T, HD): split at the sublane-tile boundary (T=8).
        q3 = qh.reshape(B, T, HD).astype(jnp.bfloat16)
        k3 = kh.reshape(B, T, HD).astype(jnp.bfloat16)
        v3 = vh.reshape(B, T, HD).astype(jnp.bfloat16)

        # Batched-over-B score / PV matmuls (flash-style einsum pattern).
        s = jnp.einsum('bqd,bkd->bqk', q3, k3,
                       preferred_element_type=jnp.float32)         # (B, T, T)
        s = jnp.where(causal, s, NEG_INF)
        s = s - jnp.max(s, axis=-1, keepdims=True)
        p = jnp.exp(s)
        p = p * pl.reciprocal(jnp.sum(p, axis=-1, keepdims=True), approx=True)

        o3 = jnp.einsum('bqk,bkd->bqd', p.astype(jnp.bfloat16), v3,
                        preferred_element_type=jnp.float32)        # (B, T, HD)

        # Out-projection split per head -> accumulate; no concatenate needed.
        att = att + jnp.dot(o3.reshape(BT, HD).astype(jnp.bfloat16),
                            wproj_ref[h], preferred_element_type=jnp.float32)

    x = x + att + bproj_ref[...]                           # residual 1

    # ---------------- MLP branch: x = x + mlp(ln_2(x)) ----------------
    xn2 = _layernorm(x, ln2w_ref[...], ln2b_ref[...])
    h1 = jnp.dot(xn2.astype(jnp.bfloat16), wfc_ref[...],
                 preferred_element_type=jnp.float32) + bfc_ref[...]
    h1 = _gelu_exact(h1)
    h2 = jnp.dot(h1.astype(jnp.bfloat16), wpr_ref[...],
                 preferred_element_type=jnp.float32) + bpr_ref[...]

    # NOTE: at production C (>=128) this store is lane-dense automatically; at
    # the toy C=32 a (B, T*C) relayout would cost more than the masked store.
    o_ref[...] = (x + h2).reshape(B, T, C).astype(o_ref.dtype)     # residual 2


def _prepare(params, n_head):
    """Wrapper-side (free) weight re-layout: split QKV per head, fold the
    1/sqrt(hd) score scale into W_q/b_q, split the attention out-projection
    per head, and cast matmul weights to bf16 (biases / LN params stay f32)."""
    C = params["w_qkv"].shape[0]
    HD = C // n_head
    scale = 1.0 / math.sqrt(HD)

    wq, wk, wv = (params["w_qkv"][:, :C], params["w_qkv"][:, C:2 * C],
                  params["w_qkv"][:, 2 * C:])
    bq, bk, bv = (params["b_qkv"][:, :C], params["b_qkv"][:, C:2 * C],
                  params["b_qkv"][:, 2 * C:])

    per_head_w = lambda w: jnp.transpose(w.reshape(C, n_head, HD), (1, 0, 2))
    per_head_b = lambda b: b.reshape(n_head, 1, HD)
    bf16 = lambda a: a.astype(jnp.bfloat16)

    return dict(
        ln1_w=params["ln1_w"], ln1_b=params["ln1_b"],
        wq=bf16(per_head_w(wq) * scale), wk=bf16(per_head_w(wk)),
        wv=bf16(per_head_w(wv)),
        bq=(per_head_b(bq) * scale).astype(jnp.float32),
        bk=per_head_b(bk), bv=per_head_b(bv),
        wproj=bf16(params["w_proj"].reshape(n_head, HD, C)),
        bproj=params["b_proj"],
        ln2_w=params["ln2_w"], ln2_b=params["ln2_b"],
        wfc=bf16(params["w_fc"]), bfc=params["b_fc"],
        wpr=bf16(params["w_pr2"]), bpr=params["b_pr2"],
    )


def gpt_block(x, params, n_head=N_HEAD):
    """x: (B, T, C) float32.  Single pallas_call, no grid: every operand is
    tiny and lives whole in VMEM; batch/seq are folded into the matmul M
    dimension inside the kernel.  For production C (>=768) the QKV/MLP dots
    should instead be tiled over K/N with a grid + f32 VMEM accumulator so the
    double-buffered weights fit v7x's 64 MiB VMEM; unnecessary at toy size."""
    B, T, C = x.shape
    p = _prepare(params, n_head)
    return pl.pallas_call(
        block_kernel,
        out_shape=jax.ShapeDtypeStruct((B, T, C), x.dtype),
        compiler_params=pltpu.CompilerParams(vmem_limit_bytes=32 * 1024 * 1024),
    )(x,
      p["ln1_w"], p["ln1_b"],
      p["wq"], p["wk"], p["wv"],
      p["bq"], p["bk"], p["bv"],
      p["wproj"], p["bproj"],
      p["ln2_w"], p["ln2_b"],
      p["wfc"], p["bfc"],
      p["wpr"], p["bpr"])


def init_params(key, C=N_EMBD, factor=MLP_FACTOR):
    """Deterministic synthetic init. Weights stored (in, out), i.e. already
    transposed relative to torch.nn.Linear's (out, in)."""
    H = factor * C
    ks = jax.random.split(key, 8)
    n = lambda k, shape: (0.02 * jax.random.normal(k, shape)).astype(jnp.float32)
    z = lambda shape: jnp.zeros(shape, jnp.float32)
    return {
        "ln1_w": jnp.ones((1, C), jnp.float32),
        "ln1_b": jnp.zeros((1, C), jnp.float32),
        "w_qkv": n(ks[0], (C, 3 * C)),
        "b_qkv": n(ks[1], (1, 3 * C)) if BIAS else z((1, 3 * C)),
        "w_proj": n(ks[2], (C, C)),
        "b_proj": n(ks[3], (1, C)) if BIAS else z((1, C)),
        "ln2_w": jnp.ones((1, C), jnp.float32),
        "ln2_b": jnp.zeros((1, C), jnp.float32),
        "w_fc": n(ks[4], (C, H)),
        "b_fc": n(ks[5], (1, H)) if BIAS else z((1, H)),
        "w_pr2": n(ks[6], (H, C)),
        "b_pr2": n(ks[7], (1, C)) if BIAS else z((1, C)),
    }


def block_reference(x, params, n_head=N_HEAD):
    """Pure-JAX f32 reference of the PyTorch Block forward (dropout=identity)."""
    B, T, C = x.shape
    HD = C // n_head

    def ln(v, w, b):
        mu = v.mean(-1, keepdims=True)
        var = ((v - mu) ** 2).mean(-1, keepdims=True)
        return (v - mu) / jnp.sqrt(var + LN_EPS) * w[0] + b[0]

    xn = ln(x, params["ln1_w"], params["ln1_b"])
    qkv = xn @ params["w_qkv"] + params["b_qkv"][0]
    q, k, v = jnp.split(qkv, 3, axis=-1)
    q = q.reshape(B, T, n_head, HD).transpose(0, 2, 1, 3)
    k = k.reshape(B, T, n_head, HD).transpose(0, 2, 1, 3)
    v = v.reshape(B, T, n_head, HD).transpose(0, 2, 1, 3)
    att = (q @ jnp.swapaxes(k, -1, -2)) * (1.0 / math.sqrt(HD))
    mask = jnp.tril(jnp.ones((T, T), dtype=bool))
    att = jnp.where(mask, att, -jnp.inf)
    att = jax.nn.softmax(att, axis=-1)
    y = (att @ v).transpose(0, 2, 1, 3).reshape(B, T, C)
    y = y @ params["w_proj"] + params["b_proj"][0]
    x = x + y
    xn2 = ln(x, params["ln2_w"], params["ln2_b"])
    h = xn2 @ params["w_fc"] + params["b_fc"][0]
    h = 0.5 * h * (1.0 + jax.lax.erf(h * 0.7071067811865476))
    h = h @ params["w_pr2"] + params["b_pr2"][0]
    return x + h


if __name__ == "__main__":
    key = jax.random.PRNGKey(0)
    kx, kp = jax.random.split(key)
    x = jax.random.normal(kx, (BATCH, SEQ, N_EMBD), dtype=jnp.float32)
    params = init_params(kp)

    out = jax.block_until_ready(gpt_block(x, params))
    assert out.shape == (BATCH, SEQ, N_EMBD)
    assert bool(jnp.all(jnp.isfinite(out)))

    ref = block_reference(x, params)
    max_err = float(jnp.max(jnp.abs(out - ref)))
    assert max_err < 5e-2, f"mismatch vs f32 reference: {max_err}"
    print("KERNEL_OK")
</pallas_src>

<mosaic_0001>
module attributes {stable_mosaic.version = 11 : i64} {
  func.func @block_kernel(%arg0: memref<2x8x32xf32, #tpu.memory_space<vmem>>, %arg1: memref<1x32xf32, #tpu.memory_space<vmem>>, %arg2: memref<1x32xf32, #tpu.memory_space<vmem>>, %arg3: memref<4x32x8xbf16, #tpu.memory_space<vmem>>, %arg4: memref<4x32x8xbf16, #tpu.memory_space<vmem>>, %arg5: memref<4x32x8xbf16, #tpu.memory_space<vmem>>, %arg6: memref<4x1x8xf32, #tpu.memory_space<vmem>>, %arg7: memref<4x1x8xf32, #tpu.memory_space<vmem>>, %arg8: memref<4x1x8xf32, #tpu.memory_space<vmem>>, %arg9: memref<4x8x32xbf16, #tpu.memory_space<vmem>>, %arg10: memref<1x32xf32, #tpu.memory_space<vmem>>, %arg11: memref<1x32xf32, #tpu.memory_space<vmem>>, %arg12: memref<1x32xf32, #tpu.memory_space<vmem>>, %arg13: memref<32x128xbf16, #tpu.memory_space<vmem>>, %arg14: memref<1x128xf32, #tpu.memory_space<vmem>>, %arg15: memref<128x32xbf16, #tpu.memory_space<vmem>>, %arg16: memref<1x32xf32, #tpu.memory_space<vmem>>, %arg17: memref<2x8x32xf32, #tpu.memory_space<vmem>>) attributes {dimension_semantics = [], scalar_prefetch = 0 : i64, scratch_operands = 0 : i64, tpu.core_type = #tpu.core_type<tc>} {
    %c0 = arith.constant 0 : index
    %c0_0 = arith.constant 0 : index
    %c0_1 = arith.constant 0 : index
    %0 = vector.load %arg0[%c0, %c0_0, %c0_1] : memref<2x8x32xf32, #tpu.memory_space<vmem>>, vector<2x8x32xf32>
    %1 = vector.shape_cast %0 : vector<2x8x32xf32> to vector<16x32xf32>
    %c0_2 = arith.constant 0 : index
    %c0_3 = arith.constant 0 : index
    %2 = vector.load %arg1[%c0_2, %c0_3] : memref<1x32xf32, #tpu.memory_space<vmem>>, vector<1x32xf32>
    %c0_4 = arith.constant 0 : index
    %c0_5 = arith.constant 0 : index
    %3 = vector.load %arg2[%c0_4, %c0_5] : memref<1x32xf32, #tpu.memory_space<vmem>>, vector<1x32xf32>
    %cst = arith.constant dense<0.000000e+00> : vector<16xf32>
    %4 = vector.multi_reduction <add>, %1, %cst [1] : vector<16x32xf32> to vector<16xf32>
    %5 = vector.shape_cast %4 : vector<16xf32> to vector<16x1xf32>
    %cst_6 = arith.constant 3.200000e+01 : f32
    %6 = vector.broadcast %cst_6 : f32 to vector<16x1xf32>
    %7 = arith.divf %5, %6 : vector<16x1xf32>
    %8 = vector.broadcast %7 : vector<16x1xf32> to vector<16x32xf32>
    %9 = arith.subf %1, %8 : vector<16x32xf32>
    %10 = arith.mulf %9, %9 : vector<16x32xf32>
    %cst_7 = arith.constant dense<0.000000e+00> : vector<16xf32>
    %11 = vector.multi_reduction <add>, %10, %cst_7 [1] : vector<16x32xf32> to vector<16xf32>
    %12 = vector.shape_cast %11 : vector<16xf32> to vector<16x1xf32>
    %cst_8 = arith.constant 3.200000e+01 : f32
    %13 = vector.broadcast %cst_8 : f32 to vector<16x1xf32>
    %14 = arith.divf %12, %13 : vector<16x1xf32>
    %15 = vector.broadcast %7 : vector<16x1xf32> to vector<16x32xf32>
    %16 = arith.subf %1, %15 : vector<16x32xf32>
    %cst_9 = arith.constant 9.99999974E-6 : f32
    %17 = vector.broadcast %cst_9 : f32 to vector<16x1xf32>
    %18 = arith.addf %14, %17 : vector<16x1xf32>
    %19 = math.rsqrt %18 : vector<16x1xf32>
    %20 = vector.broadcast %19 : vector<16x1xf32> to vector<16x32xf32>
    %21 = arith.mulf %16, %20 : vector<16x32xf32>
    %22 = vector.broadcast %2 : vector<1x32xf32> to vector<16x32xf32>
    %23 = arith.mulf %21, %22 : vector<16x32xf32>
    %24 = vector.broadcast %3 : vector<1x32xf32> to vector<16x32xf32>
    %25 = arith.addf %23, %24 : vector<16x32xf32>
    %26 = arith.truncf %25 : vector<16x32xf32> to vector<16x32xbf16>
    %27 = tpu.iota {dimensions = array<i32: 1>} : vector<2x8x8xi32>
    %28 = tpu.iota {dimensions = array<i32: 2>} : vector<2x8x8xi32>
    %29 = arith.cmpi sle, %28, %27 : vector<2x8x8xi32>
    %cst_10 = arith.constant 0.000000e+00 : f32
    %30 = vector.broadcast %cst_10 : f32 to vector<16x32xf32>
    %c0_11 = arith.constant 0 : index
    %c0_12 = arith.constant 0 : index
    %c0_13 = arith.constant 0 : index
    %31 = vector.load %arg3[%c0_11, %c0_12, %c0_13] : memref<4x32x8xbf16, #tpu.memory_space<vmem>>, vector<1x32x8xbf16>
    %32 = vector.shape_cast %31 : vector<1x32x8xbf16> to vector<32x8xbf16>
    %cst_14 = arith.constant dense<0.000000e+00> : vector<16x8xf32>
    %33 = tpu.matmul %26, %32, %cst_14 {dimension_numbers = #tpu.dot_dimension_numbers<[1], [0], [0], [1], [0, 0, 1, 1], [], []>} : vector<16x32xbf16>, vector<32x8xbf16>, vector<16x8xf32> -> vector<16x8xf32>
    %c0_15 = arith.constant 0 : index
    %c0_16 = arith.constant 0 : index
    %c0_17 = arith.constant 0 : index
    %34 = vector.load %arg6[%c0_15, %c0_16, %c0_17] : memref<4x1x8xf32, #tpu.memory_space<vmem>>, vector<1x1x8xf32>
    %35 = vector.shape_cast %34 : vector<1x1x8xf32> to vector<1x8xf32>
    %36 = vector.broadcast %35 : vector<1x8xf32> to vector<16x8xf32>
    %37 = arith.addf %33, %36 : vector<16x8xf32>
    %c0_18 = arith.constant 0 : index
    %c0_19 = arith.constant 0 : index
    %c0_20 = arith.constant 0 : index
    %38 = vector.load %arg4[%c0_18, %c0_19, %c0_20] : memref<4x32x8xbf16, #tpu.memory_space<vmem>>, vector<1x32x8xbf16>
    %39 = vector.shape_cast %38 : vector<1x32x8xbf16> to vector<32x8xbf16>
    %cst_21 = arith.constant dense<0.000000e+00> : vector<16x8xf32>
    %40 = tpu.matmul %26, %39, %cst_21 {dimension_numbers = #tpu.dot_dimension_numbers<[1], [0], [0], [1], [0, 0, 1, 1], [], []>} : vector<16x32xbf16>, vector<32x8xbf16>, vector<16x8xf32> -> vector<16x8xf32>
    %c0_22 = arith.constant 0 : index
    %c0_23 = arith.constant 0 : index
    %c0_24 = arith.constant 0 : index
    %41 = vector.load %arg7[%c0_22, %c0_23, %c0_24] : memref<4x1x8xf32, #tpu.memory_space<vmem>>, vector<1x1x8xf32>
    %42 = vector.shape_cast %41 : vector<1x1x8xf32> to vector<1x8xf32>
    %43 = vector.broadcast %42 : vector<1x8xf32> to vector<16x8xf32>
    %44 = arith.addf %40, %43 : vector<16x8xf32>
    %c0_25 = arith.constant 0 : index
    %c0_26 = arith.constant 0 : index
    %c0_27 = arith.constant 0 : index
    %45 = vector.load %arg5[%c0_25, %c0_26, %c0_27] : memref<4x32x8xbf16, #tpu.memory_space<vmem>>, vector<1x32x8xbf16>
    %46 = vector.shape_cast %45 : vector<1x32x8xbf16> to vector<32x8xbf16>
    %cst_28 = arith.constant dense<0.000000e+00> : vector<16x8xf32>
    %47 = tpu.matmul %26, %46, %cst_28 {dimension_numbers = #tpu.dot_dimension_numbers<[1], [0], [0], [1], [0, 0, 1, 1], [], []>} : vector<16x32xbf16>, vector<32x8xbf16>, vector<16x8xf32> -> vector<16x8xf32>
    %c0_29 = arith.constant 0 : index
    %c0_30 = arith.constant 0 : index
    %c0_31 = arith.constant 0 : index
    %48 = vector.load %arg8[%c0_29, %c0_30, %c0_31] : memref<4x1x8xf32, #tpu.memory_space<vmem>>, vector<1x1x8xf32>
    %49 = vector.shape_cast %48 : vector<1x1x8xf32> to vector<1x8xf32>
    %50 = vector.broadcast %49 : vector<1x8xf32> to vector<16x8xf32>
    %51 = arith.addf %47, %50 : vector<16x8xf32>
    %52 = vector.shape_cast %37 : vector<16x8xf32> to vector<2x8x8xf32>
    %53 = arith.truncf %52 : vector<2x8x8xf32> to vector<2x8x8xbf16>
    %54 = vector.shape_cast %44 : vector<16x8xf32> to vector<2x8x8xf32>
    %55 = arith.truncf %54 : vector<2x8x8xf32> to vector<2x8x8xbf16>
    %56 = vector.shape_cast %51 : vector<16x8xf32> to vector<2x8x8xf32>
    %57 = arith.truncf %56 : vector<2x8x8xf32> to vector<2x8x8xbf16>
    "tpu.trace_start"() <{level = 10 : i32, message = "bqd,bkd->bqk"}> : () -> ()
    %cst_32 = arith.constant dense<0.000000e+00> : vector<2x8x8xf32>
    %58 = tpu.matmul %53, %55, %cst_32 {dimension_numbers = #tpu.dot_dimension_numbers<[2], [2], [1], [1], [0, 0, 0, 1, 1, 1], [0], [0]>} : vector<2x8x8xbf16>, vector<2x8x8xbf16>, vector<2x8x8xf32> -> vector<2x8x8xf32>
    %cst_33 = arith.constant -1.000000e+30 : f32
    "tpu.trace_stop"() : () -> ()
    %59 = vector.broadcast %cst_33 : f32 to vector<2x8x8xf32>
    %60 = arith.select %29, %58, %59 : vector<2x8x8xi1>, vector<2x8x8xf32>
    %cst_34 = arith.constant dense<0xFF800000> : vector<2x8xf32>
    %61 = vector.multi_reduction <maximumf>, %60, %cst_34 [2] : vector<2x8x8xf32> to vector<2x8xf32>
    %62 = vector.shape_cast %61 : vector<2x8xf32> to vector<2x8x1xf32>
    %63 = vector.broadcast %62 : vector<2x8x1xf32> to vector<2x8x8xf32>
    %64 = arith.subf %60, %63 : vector<2x8x8xf32>
    %65 = math.exp %64 : vector<2x8x8xf32>
    %cst_35 = arith.constant dense<0.000000e+00> : vector<2x8xf32>
    %66 = vector.multi_reduction <add>, %65, %cst_35 [2] : vector<2x8x8xf32> to vector<2x8xf32>
    %67 = vector.shape_cast %66 : vector<2x8xf32> to vector<2x8x1xf32>
    %68 = tpu.reciprocal %67 {approx = true} : vector<2x8x1xf32> -> vector<2x8x1xf32>
    %69 = vector.broadcast %68 : vector<2x8x1xf32> to vector<2x8x8xf32>
    %70 = arith.mulf %65, %69 : vector<2x8x8xf32>
    %71 = arith.truncf %70 : vector<2x8x8xf32> to vector<2x8x8xbf16>
    "tpu.trace_start"() <{level = 10 : i32, message = "bqk,bkd->bqd"}> : () -> ()
    %cst_36 = arith.constant dense<0.000000e+00> : vector<2x8x8xf32>
    %72 = tpu.matmul %71, %57, %cst_36 {dimension_numbers = #tpu.dot_dimension_numbers<[2], [1], [1], [2], [0, 0, 0, 1, 1, 2], [0], [0]>} : vector<2x8x8xbf16>, vector<2x8x8xbf16>, vector<2x8x8xf32> -> vector<2x8x8xf32>
    "tpu.trace_stop"() : () -> ()
    %73 = vector.shape_cast %72 : vector<2x8x8xf32> to vector<16x8xf32>
    %74 = arith.truncf %73 : vector<16x8xf32> to vector<16x8xbf16>
    %c0_37 = arith.constant 0 : index
    %c0_38 = arith.constant 0 : index
    %c0_39 = arith.constant 0 : index
    %75 = vector.load %arg9[%c0_37, %c0_38, %c0_39] : memref<4x8x32xbf16, #tpu.memory_space<vmem>>, vector<1x8x32xbf16>
    %76 = vector.shape_cast %75 : vector<1x8x32xbf16> to vector<8x32xbf16>
    %cst_40 = arith.constant dense<0.000000e+00> : vector<16x32xf32>
    %77 = tpu.matmul %74, %76, %cst_40 {dimension_numbers = #tpu.dot_dimension_numbers<[1], [0], [0], [1], [0, 0, 1, 1], [], []>} : vector<16x8xbf16>, vector<8x32xbf16>, vector<16x32xf32> -> vector<16x32xf32>
    %78 = arith.addf %30, %77 : vector<16x32xf32>
    %c1 = arith.constant 1 : index
    %c0_41 = arith.constant 0 : index
    %c0_42 = arith.constant 0 : index
    %79 = vector.load %arg3[%c1, %c0_41, %c0_42] : memref<4x32x8xbf16, #tpu.memory_space<vmem>>, vector<1x32x8xbf16>
    %80 = vector.shape_cast %79 : vector<1x32x8xbf16> to vector<32x8xbf16>
    %cst_43 = arith.constant dense<0.000000e+00> : vector<16x8xf32>
    %81 = tpu.matmul %26, %80, %cst_43 {dimension_numbers = #tpu.dot_dimension_numbers<[1], [0], [0], [1], [0, 0, 1, 1], [], []>} : vector<16x32xbf16>, vector<32x8xbf16>, vector<16x8xf32> -> vector<16x8xf32>
    %c1_44 = arith.constant 1 : index
    %c0_45 = arith.constant 0 : index
    %c0_46 = arith.constant 0 : index
    %82 = vector.load %arg6[%c1_44, %c0_45, %c0_46] : memref<4x1x8xf32, #tpu.memory_space<vmem>>, vector<1x1x8xf32>
    %83 = vector.shape_cast %82 : vector<1x1x8xf32> to vector<1x8xf32>
    %84 = vector.broadcast %83 : vector<1x8xf32> to vector<16x8xf32>
    %85 = arith.addf %81, %84 : vector<16x8xf32>
    %c1_47 = arith.constant 1 : index
    %c0_48 = arith.constant 0 : index
    %c0_49 = arith.constant 0 : index
    %86 = vector.load %arg4[%c1_47, %c0_48, %c0_49] : memref<4x32x8xbf16, #tpu.memory_space<vmem>>, vector<1x32x8xbf16>
    %87 = vector.shape_cast %86 : vector<1x32x8xbf16> to vector<32x8xbf16>
    %cst_50 = arith.constant dense<0.000000e+00> : vector<16x8xf32>
    %88 = tpu.matmul %26, %87, %cst_50 {dimension_numbers = #tpu.dot_dimension_numbers<[1], [0], [0], [1], [0, 0, 1, 1], [], []>} : vector<16x32xbf16>, vector<32x8xbf16>, vector<16x8xf32> -> vector<16x8xf32>
    %c1_51 = arith.constant 1 : index
    %c0_52 = arith.constant 0 : index
    %c0_53 = arith.constant 0 : index
    %89 = vector.load %arg7[%c1_51, %c0_52, %c0_53] : memref<4x1x8xf32, #tpu.memory_space<vmem>>, vector<1x1x8xf32>
    %90 = vector.shape_cast %89 : vector<1x1x8xf32> to vector<1x8xf32>
    %91 = vector.broadcast %90 : vector<1x8xf32> to vector<16x8xf32>
    %92 = arith.addf %88, %91 : vector<16x8xf32>
    %c1_54 = arith.constant 1 : index
    %c0_55 = arith.constant 0 : index
    %c0_56 = arith.constant 0 : index
    %93 = vector.load %arg5[%c1_54, %c0_55, %c0_56] : memref<4x32x8xbf16, #tpu.memory_space<vmem>>, vector<1x32x8xbf16>
    %94 = vector.shape_cast %93 : vector<1x32x8xbf16> to vector<32x8xbf16>
    %cst_57 = arith.constant dense<0.000000e+00> : vector<16x8xf32>
    %95 = tpu.matmul %26, %94, %cst_57 {dimension_numbers = #tpu.dot_dimension_numbers<[1], [0], [0], [1], [0, 0, 1, 1], [], []>} : vector<16x32xbf16>, vector<32x8xbf16>, vector<16x8xf32> -> vector<16x8xf32>
    %c1_58 = arith.constant 1 : index
    %c0_59 = arith.constant 0 : index
    %c0_60 = arith.constant 0 : index
    %96 = vector.load %arg8[%c1_58, %c0_59, %c0_60] : memref<4x1x8xf32, #tpu.memory_space<vmem>>, vector<1x1x8xf32>
    %97 = vector.shape_cast %96 : vector<1x1x8xf32> to vector<1x8xf32>
    %98 = vector.broadcast %97 : vector<1x8xf32> to vector<16x8xf32>
    %99 = arith.addf %95, %98 : vector<16x8xf32>
    %100 = vector.shape_cast %85 : vector<16x8xf32> to vector<2x8x8xf32>
    %101 = arith.truncf %100 : vector<2x8x8xf32> to vector<2x8x8xbf16>
    %102 = vector.shape_cast %92 : vector<16x8xf32> to vector<2x8x8xf32>
    %103 = arith.truncf %102 : vector<2x8x8xf32> to vector<2x8x8xbf16>
    %104 = vector.shape_cast %99 : vector<16x8xf32> to vector<2x8x8xf32>
    %105 = arith.truncf %104 : vector<2x8x8xf32> to vector<2x8x8xbf16>
    "tpu.trace_start"() <{level = 10 : i32, message = "bqd,bkd->bqk"}> : () -> ()
    %cst_61 = arith.constant dense<0.000000e+00> : vector<2x8x8xf32>
    %106 = tpu.matmul %101, %103, %cst_61 {dimension_numbers = #tpu.dot_dimension_numbers<[2], [2], [1], [1], [0, 0, 0, 1, 1, 1], [0], [0]>} : vector<2x8x8xbf16>, vector<2x8x8xbf16>, vector<2x8x8xf32> -> vector<2x8x8xf32>
    %cst_62 = arith.constant -1.000000e+30 : f32
    "tpu.trace_stop"() : () -> ()
    %107 = vector.broadcast %cst_62 : f32 to vector<2x8x8xf32>
    %108 = arith.select %29, %106, %107 : vector<2x8x8xi1>, vector<2x8x8xf32>
    %cst_63 = arith.constant dense<0xFF800000> : vector<2x8xf32>
    %109 = vector.multi_reduction <maximumf>, %108, %cst_63 [2] : vector<2x8x8xf32> to vector<2x8xf32>
    %110 = vector.shape_cast %109 : vector<2x8xf32> to vector<2x8x1xf32>
    %111 = vector.broadcast %110 : vector<2x8x1xf32> to vector<2x8x8xf32>
    %112 = arith.subf %108, %111 : vector<2x8x8xf32>
    %113 = math.exp %112 : vector<2x8x8xf32>
    %cst_64 = arith.constant dense<0.000000e+00> : vector<2x8xf32>
    %114 = vector.multi_reduction <add>, %113, %cst_64 [2] : vector<2x8x8xf32> to vector<2x8xf32>
    %115 = vector.shape_cast %114 : vector<2x8xf32> to vector<2x8x1xf32>
    %116 = tpu.reciprocal %115 {approx = true} : vector<2x8x1xf32> -> vector<2x8x1xf32>
    %117 = vector.broadcast %116 : vector<2x8x1xf32> to vector<2x8x8xf32>
    %118 = arith.mulf %113, %117 : vector<2x8x8xf32>
    %119 = arith.truncf %118 : vector<2x8x8xf32> to vector<2x8x8xbf16>
    "tpu.trace_start"() <{level = 10 : i32, message = "bqk,bkd->bqd"}> : () -> ()
    %cst_65 = arith.constant dense<0.000000e+00> : vector<2x8x8xf32>
    %120 = tpu.matmul %119, %105, %cst_65 {dimension_numbers = #tpu.dot_dimension_numbers<[2], [1], [1], [2], [0, 0, 0, 1, 1, 2], [0], [0]>} : vector<2x8x8xbf16>, vector<2x8x8xbf16>, vector<2x8x8xf32> -> vector<2x8x8xf32>
    "tpu.trace_stop"() : () -> ()
    %121 = vector.shape_cast %120 : vector<2x8x8xf32> to vector<16x8xf32>
    %122 = arith.truncf %121 : vector<16x8xf32> to vector<16x8xbf16>
    %c1_66 = arith.constant 1 : index
    %c0_67 = arith.constant 0 : index
    %c0_68 = arith.constant 0 : index
    %123 = vector.load %arg9[%c1_66, %c0_67, %c0_68] : memref<4x8x32xbf16, #tpu.memory_space<vmem>>, vector<1x8x32xbf16>
    %124 = vector.shape_cast %123 : vector<1x8x32xbf16> to vector<8x32xbf16>
    %cst_69 = arith.constant dense<0.000000e+00> : vector<16x32xf32>
    %125 = tpu.matmul %122, %124, %cst_69 {dimension_numbers = #tpu.dot_dimension_numbers<[1], [0], [0], [1], [0, 0, 1, 1], [], []>} : vector<16x8xbf16>, vector<8x32xbf16>, vector<16x32xf32> -> vector<16x32xf32>
    %126 = arith.addf %78, %125 : vector<16x32xf32>
    %c2 = arith.constant 2 : index
    %c0_70 = arith.constant 0 : index
    %c0_71 = arith.constant 0 : index
    %127 = vector.load %arg3[%c2, %c0_70, %c0_71] : memref<4x32x8xbf16, #tpu.memory_space<vmem>>, vector<1x32x8xbf16>
    %128 = vector.shape_cast %127 : vector<1x32x8xbf16> to vector<32x8xbf16>
    %cst_72 = arith.constant dense<0.000000e+00> : vector<16x8xf32>
    %129 = tpu.matmul %26, %128, %cst_72 {dimension_numbers = #tpu.dot_dimension_numbers<[1], [0], [0], [1], [0, 0, 1, 1], [], []>} : vector<16x32xbf16>, vector<32x8xbf16>, vector<16x8xf32> -> vector<16x8xf32>
    %c2_73 = arith.constant 2 : index
    %c0_74 = arith.constant 0 : index
    %c0_75 = arith.constant 0 : index
    %130 = vector.load %arg6[%c2_73, %c0_74, %c0_75] : memref<4x1x8xf32, #tpu.memory_space<vmem>>, vector<1x1x8xf32>
    %131 = vector.shape_cast %130 : vector<1x1x8xf32> to vector<1x8xf32>
    %132 = vector.broadcast %131 : vector<1x8xf32> to vector<16x8xf32>
    %133 = arith.addf %129, %132 : vector<16x8xf32>
    %c2_76 = arith.constant 2 : index
    %c0_77 = arith.constant 0 : index
    %c0_78 = arith.constant 0 : index
    %134 = vector.load %arg4[%c2_76, %c0_77, %c0_78] : memref<4x32x8xbf16, #tpu.memory_space<vmem>>, vector<1x32x8xbf16>
    %135 = vector.shape_cast %134 : vector<1x32x8xbf16> to vector<32x8xbf16>
    %cst_79 = arith.constant dense<0.000000e+00> : vector<16x8xf32>
    %136 = tpu.matmul %26, %135, %cst_79 {dimension_numbers = #tpu.dot_dimension_numbers<[1], [0], [0], [1], [0, 0, 1, 1], [], []>} : vector<16x32xbf16>, vector<32x8xbf16>, vector<16x8xf32> -> vector<16x8xf32>
    %c2_80 = arith.constant 2 : index
    %c0_81 = arith.constant 0 : index
    %c0_82 = arith.constant 0 : index
    %137 = vector.load %arg7[%c2_80, %c0_81, %c0_82] : memref<4x1x8xf32, #tpu.memory_space<vmem>>, vector<1x1x8xf32>
    %138 = vector.shape_cast %137 : vector<1x1x8xf32> to vector<1x8xf32>
    %139 = vector.broadcast %138 : vector<1x8xf32> to vector<16x8xf32>
    %140 = arith.addf %136, %139 : vector<16x8xf32>
    %c2_83 = arith.constant 2 : index
    %c0_84 = arith.constant 0 : index
    %c0_85 = arith.constant 0 : index
    %141 = vector.load %arg5[%c2_83, %c0_84, %c0_85] : memref<4x32x8xbf16, #tpu.memory_space<vmem>>, vector<1x32x8xbf16>
    %142 = vector.shape_cast %141 : vector<1x32x8xbf16> to vector<32x8xbf16>
    %cst_86 = arith.constant dense<0.000000e+00> : vector<16x8xf32>
    %143 = tpu.matmul %26, %142, %cst_86 {dimension_numbers = #tpu.dot_dimension_numbers<[1], [0], [0], [1], [0, 0, 1, 1], [], []>} : vector<16x32xbf16>, vector<32x8xbf16>, vector<16x8xf32> -> vector<16x8xf32>
    %c2_87 = arith.constant 2 : index
    %c0_88 = arith.constant 0 : index
    %c0_89 = arith.constant 0 : index
    %144 = vector.load %arg8[%c2_87, %c0_88, %c0_89] : memref<4x1x8xf32, #tpu.memory_space<vmem>>, vector<1x1x8xf32>
    %145 = vector.shape_cast %144 : vector<1x1x8xf32> to vector<1x8xf32>
    %146 = vector.broadcast %145 : vector<1x8xf32> to vector<16x8xf32>
    %147 = arith.addf %143, %146 : vector<16x8xf32>
    %148 = vector.shape_cast %133 : vector<16x8xf32> to vector<2x8x8xf32>
    %149 = arith.truncf %148 : vector<2x8x8xf32> to vector<2x8x8xbf16>
    %150 = vector.shape_cast %140 : vector<16x8xf32> to vector<2x8x8xf32>
    %151 = arith.truncf %150 : vector<2x8x8xf32> to vector<2x8x8xbf16>
    %152 = vector.shape_cast %147 : vector<16x8xf32> to vector<2x8x8xf32>
    %153 = arith.truncf %152 : vector<2x8x8xf32> to vector<2x8x8xbf16>
    "tpu.trace_start"() <{level = 10 : i32, message = "bqd,bkd->bqk"}> : () -> ()
    %cst_90 = arith.constant dense<0.000000e+00> : vector<2x8x8xf32>
    %154 = tpu.matmul %149, %151, %cst_90 {dimension_numbers = #tpu.dot_dimension_numbers<[2], [2], [1], [1], [0, 0, 0, 1, 1, 1], [0], [0]>} : vector<2x8x8xbf16>, vector<2x8x8xbf16>, vector<2x8x8xf32> -> vector<2x8x8xf32>
    %cst_91 = arith.constant -1.000000e+30 : f32
    "tpu.trace_stop"() : () -> ()
    %155 = vector.broadcast %cst_91 : f32 to vector<2x8x8xf32>
    %156 = arith.select %29, %154, %155 : vector<2x8x8xi1>, vector<2x8x8xf32>
    %cst_92 = arith.constant dense<0xFF800000> : vector<2x8xf32>
    %157 = vector.multi_reduction <maximumf>, %156, %cst_92 [2] : vector<2x8x8xf32> to vector<2x8xf32>
    %158 = vector.shape_cast %157 : vector<2x8xf32> to vector<2x8x1xf32>
    %159 = vector.broadcast %158 : vector<2x8x1xf32> to vector<2x8x8xf32>
    %160 = arith.subf %156, %159 : vector<2x8x8xf32>
    %161 = math.exp %160 : vector<2x8x8xf32>
    %cst_93 = arith.constant dense<0.000000e+00> : vector<2x8xf32>
    %162 = vector.multi_reduction <add>, %161, %cst_93 [2] : vector<2x8x8xf32> to vector<2x8xf32>
    %163 = vector.shape_cast %162 : vector<2x8xf32> to vector<2x8x1xf32>
    %164 = tpu.reciprocal %163 {approx = true} : vector<2x8x1xf32> -> vector<2x8x1xf32>
    %165 = vector.broadcast %164 : vector<2x8x1xf32> to vector<2x8x8xf32>
    %166 = arith.mulf %161, %165 : vector<2x8x8xf32>
    %167 = arith.truncf %166 : vector<2x8x8xf32> to vector<2x8x8xbf16>
    "tpu.trace_start"() <{level = 10 : i32, message = "bqk,bkd->bqd"}> : () -> ()
    %cst_94 = arith.constant dense<0.000000e+00> : vector<2x8x8xf32>
    %168 = tpu.matmul %167, %153, %cst_94 {dimension_numbers = #tpu.dot_dimension_numbers<[2], [1], [1], [2], [0, 0, 0, 1, 1, 2], [0], [0]>} : vector<2x8x8xbf16>, vector<2x8x8xbf16>, vector<2x8x8xf32> -> vector<2x8x8xf32>
    "tpu.trace_stop"() : () -> ()
    %169 = vector.shape_cast %168 : vector<2x8x8xf32> to vector<16x8xf32>
    %170 = arith.truncf %169 : vector<16x8xf32> to vector<16x8xbf16>
    %c2_95 = arith.constant 2 : index
    %c0_96 = arith.constant 0 : index
    %c0_97 = arith.constant 0 : index
    %171 = vector.load %arg9[%c2_95, %c0_96, %c0_97] : memref<4x8x32xbf16, #tpu.memory_space<vmem>>, vector<1x8x32xbf16>
    %172 = vector.shape_cast %171 : vector<1x8x32xbf16> to vector<8x32xbf16>
    %cst_98 = arith.constant dense<0.000000e+00> : vector<16x32xf32>
    %173 = tpu.matmul %170, %172, %cst_98 {dimension_numbers = #tpu.dot_dimension_numbers<[1], [0], [0], [1], [0, 0, 1, 1], [], []>} : vector<16x8xbf16>, vector<8x32xbf16>, vector<16x32xf32> -> vector<16x32xf32>
    %174 = arith.addf %126, %173 : vector<16x32xf32>
    %c3 = arith.constant 3 : index
    %c0_99 = arith.constant 0 : index
    %c0_100 = arith.constant 0 : index
    %175 = vector.load %arg3[%c3, %c0_99, %c0_100] : memref<4x32x8xbf16, #tpu.memory_space<vmem>>, vector<1x32x8xbf16>
    %176 = vector.shape_cast %175 : vector<1x32x8xbf16> to vector<32x8xbf16>
    %cst_101 = arith.constant dense<0.000000e+00> : vector<16x8xf32>
    %177 = tpu.matmul %26, %176, %cst_101 {dimension_numbers = #tpu.dot_dimension_numbers<[1], [0], [0], [1], [0, 0, 1, 1], [], []>} : vector<16x32xbf16>, vector<32x8xbf16>, vector<16x8xf32> -> vector<16x8xf32>
    %c3_102 = arith.constant 3 : index
    %c0_103 = arith.constant 0 : index
    %c0_104 = arith.constant 0 : index
    %178 = vector.load %arg6[%c3_102, %c0_103, %c0_104] : memref<4x1x8xf32, #tpu.memory_space<vmem>>, vector<1x1x8xf32>
    %179 = vector.shape_cast %178 : vector<1x1x8xf32> to vector<1x8xf32>
    %180 = vector.broadcast %179 : vector<1x8xf32> to vector<16x8xf32>
    %181 = arith.addf %177, %180 : vector<16x8xf32>
    %c3_105 = arith.constant 3 : index
    %c0_106 = arith.constant 0 : index
    %c0_107 = arith.constant 0 : index
    %182 = vector.load %arg4[%c3_105, %c0_106, %c0_107] : memref<4x32x8xbf16, #tpu.memory_space<vmem>>, vector<1x32x8xbf16>
    %183 = vector.shape_cast %182 : vector<1x32x8xbf16> to vector<32x8xbf16>
    %cst_108 = arith.constant dense<0.000000e+00> : vector<16x8xf32>
    %184 = tpu.matmul %26, %183, %cst_108 {dimension_numbers = #tpu.dot_dimension_numbers<[1], [0], [0], [1], [0, 0, 1, 1], [], []>} : vector<16x32xbf16>, vector<32x8xbf16>, vector<16x8xf32> -> vector<16x8xf32>
    %c3_109 = arith.constant 3 : index
    %c0_110 = arith.constant 0 : index
    %c0_111 = arith.constant 0 : index
    %185 = vector.load %arg7[%c3_109, %c0_110, %c0_111] : memref<4x1x8xf32, #tpu.memory_space<vmem>>, vector<1x1x8xf32>
    %186 = vector.shape_cast %185 : vector<1x1x8xf32> to vector<1x8xf32>
    %187 = vector.broadcast %186 : vector<1x8xf32> to vector<16x8xf32>
    %188 = arith.addf %184, %187 : vector<16x8xf32>
    %c3_112 = arith.constant 3 : index
    %c0_113 = arith.constant 0 : index
    %c0_114 = arith.constant 0 : index
    %189 = vector.load %arg5[%c3_112, %c0_113, %c0_114] : memref<4x32x8xbf16, #tpu.memory_space<vmem>>, vector<1x32x8xbf16>
    %190 = vector.shape_cast %189 : vector<1x32x8xbf16> to vector<32x8xbf16>
    %cst_115 = arith.constant dense<0.000000e+00> : vector<16x8xf32>
    %191 = tpu.matmul %26, %190, %cst_115 {dimension_numbers = #tpu.dot_dimension_numbers<[1], [0], [0], [1], [0, 0, 1, 1], [], []>} : vector<16x32xbf16>, vector<32x8xbf16>, vector<16x8xf32> -> vector<16x8xf32>
    %c3_116 = arith.constant 3 : index
    %c0_117 = arith.constant 0 : index
    %c0_118 = arith.constant 0 : index
    %192 = vector.load %arg8[%c3_116, %c0_117, %c0_118] : memref<4x1x8xf32, #tpu.memory_space<vmem>>, vector<1x1x8xf32>
    %193 = vector.shape_cast %192 : vector<1x1x8xf32> to vector<1x8xf32>
    %194 = vector.broadcast %193 : vector<1x8xf32> to vector<16x8xf32>
    %195 = arith.addf %191, %194 : vector<16x8xf32>
    %196 = vector.shape_cast %181 : vector<16x8xf32> to vector<2x8x8xf32>
    %197 = arith.truncf %196 : vector<2x8x8xf32> to vector<2x8x8xbf16>
    %198 = vector.shape_cast %188 : vector<16x8xf32> to vector<2x8x8xf32>
    %199 = arith.truncf %198 : vector<2x8x8xf32> to vector<2x8x8xbf16>
    %200 = vector.shape_cast %195 : vector<16x8xf32> to vector<2x8x8xf32>
    %201 = arith.truncf %200 : vector<2x8x8xf32> to vector<2x8x8xbf16>
    "tpu.trace_start"() <{level = 10 : i32, message = "bqd,bkd->bqk"}> : () -> ()
    %cst_119 = arith.constant dense<0.000000e+00> : vector<2x8x8xf32>
    %202 = tpu.matmul %197, %199, %cst_119 {dimension_numbers = #tpu.dot_dimension_numbers<[2], [2], [1], [1], [0, 0, 0, 1, 1, 1], [0], [0]>} : vector<2x8x8xbf16>, vector<2x8x8xbf16>, vector<2x8x8xf32> -> vector<2x8x8xf32>
    %cst_120 = arith.constant -1.000000e+30 : f32
    "tpu.trace_stop"() : () -> ()
    %203 = vector.broadcast %cst_120 : f32 to vector<2x8x8xf32>
    %204 = arith.select %29, %202, %203 : vector<2x8x8xi1>, vector<2x8x8xf32>
    %cst_121 = arith.constant dense<0xFF800000> : vector<2x8xf32>
    %205 = vector.multi_reduction <maximumf>, %204, %cst_121 [2] : vector<2x8x8xf32> to vector<2x8xf32>
    %206 = vector.shape_cast %205 : vector<2x8xf32> to vector<2x8x1xf32>
    %207 = vector.broadcast %206 : vector<2x8x1xf32> to vector<2x8x8xf32>
    %208 = arith.subf %204, %207 : vector<2x8x8xf32>
    %209 = math.exp %208 : vector<2x8x8xf32>
    %cst_122 = arith.constant dense<0.000000e+00> : vector<2x8xf32>
    %210 = vector.multi_reduction <add>, %209, %cst_122 [2] : vector<2x8x8xf32> to vector<2x8xf32>
    %211 = vector.shape_cast %210 : vector<2x8xf32> to vector<2x8x1xf32>
    %212 = tpu.reciprocal %211 {approx = true} : vector<2x8x1xf32> -> vector<2x8x1xf32>
    %213 = vector.broadcast %212 : vector<2x8x1xf32> to vector<2x8x8xf32>
    %214 = arith.mulf %209, %213 : vector<2x8x8xf32>
    %215 = arith.truncf %214 : vector<2x8x8xf32> to vector<2x8x8xbf16>
    "tpu.trace_start"() <{level = 10 : i32, message = "bqk,bkd->bqd"}> : () -> ()
    %cst_123 = arith.constant dense<0.000000e+00> : vector<2x8x8xf32>
    %216 = tpu.matmul %215, %201, %cst_123 {dimension_numbers = #tpu.dot_dimension_numbers<[2], [1], [1], [2], [0, 0, 0, 1, 1, 2], [0], [0]>} : vector<2x8x8xbf16>, vector<2x8x8xbf16>, vector<2x8x8xf32> -> vector<2x8x8xf32>
    "tpu.trace_stop"() : () -> ()
    %217 = vector.shape_cast %216 : vector<2x8x8xf32> to vector<16x8xf32>
    %218 = arith.truncf %217 : vector<16x8xf32> to vector<16x8xbf16>
    %c3_124 = arith.constant 3 : index
    %c0_125 = arith.constant 0 : index
    %c0_126 = arith.constant 0 : index
    %219 = vector.load %arg9[%c3_124, %c0_125, %c0_126] : memref<4x8x32xbf16, #tpu.memory_space<vmem>>, vector<1x8x32xbf16>
    %220 = vector.shape_cast %219 : vector<1x8x32xbf16> to vector<8x32xbf16>
    %cst_127 = arith.constant dense<0.000000e+00> : vector<16x32xf32>
    %221 = tpu.matmul %218, %220, %cst_127 {dimension_numbers = #tpu.dot_dimension_numbers<[1], [0], [0], [1], [0, 0, 1, 1], [], []>} : vector<16x8xbf16>, vector<8x32xbf16>, vector<16x32xf32> -> vector<16x32xf32>
    %222 = arith.addf %174, %221 : vector<16x32xf32>
    %223 = arith.addf %1, %222 : vector<16x32xf32>
    %c0_128 = arith.constant 0 : index
    %c0_129 = arith.constant 0 : index
    %224 = vector.load %arg10[%c0_128, %c0_129] : memref<1x32xf32, #tpu.memory_space<vmem>>, vector<1x32xf32>
    %225 = vector.broadcast %224 : vector<1x32xf32> to vector<16x32xf32>
    %226 = arith.addf %223, %225 : vector<16x32xf32>
    %c0_130 = arith.constant 0 : index
    %c0_131 = arith.constant 0 : index
    %227 = vector.load %arg11[%c0_130, %c0_131] : memref<1x32xf32, #tpu.memory_space<vmem>>, vector<1x32xf32>
    %c0_132 = arith.constant 0 : index
    %c0_133 = arith.constant 0 : index
    %228 = vector.load %arg12[%c0_132, %c0_133] : memref<1x32xf32, #tpu.memory_space<vmem>>, vector<1x32xf32>
    %cst_134 = arith.constant dense<0.000000e+00> : vector<16xf32>
    %229 = vector.multi_reduction <add>, %226, %cst_134 [1] : vector<16x32xf32> to vector<16xf32>
    %230 = vector.shape_cast %229 : vector<16xf32> to vector<16x1xf32>
    %cst_135 = arith.constant 3.200000e+01 : f32
    %231 = vector.broadcast %cst_135 : f32 to vector<16x1xf32>
    %232 = arith.divf %230, %231 : vector<16x1xf32>
    %233 = vector.broadcast %232 : vector<16x1xf32> to vector<16x32xf32>
    %234 = arith.subf %226, %233 : vector<16x32xf32>
    %235 = arith.mulf %234, %234 : vector<16x32xf32>
    %cst_136 = arith.constant dense<0.000000e+00> : vector<16xf32>
    %236 = vector.multi_reduction <add>, %235, %cst_136 [1] : vector<16x32xf32> to vector<16xf32>
    %237 = vector.shape_cast %236 : vector<16xf32> to vector<16x1xf32>
    %cst_137 = arith.constant 3.200000e+01 : f32
    %238 = vector.broadcast %cst_137 : f32 to vector<16x1xf32>
    %239 = arith.divf %237, %238 : vector<16x1xf32>
    %240 = vector.broadcast %232 : vector<16x1xf32> to vector<16x32xf32>
    %241 = arith.subf %226, %240 : vector<16x32xf32>
    %cst_138 = arith.constant 9.99999974E-6 : f32
    %242 = vector.broadcast %cst_138 : f32 to vector<16x1xf32>
    %243 = arith.addf %239, %242 : vector<16x1xf32>
    %244 = math.rsqrt %243 : vector<16x1xf32>
    %245 = vector.broadcast %244 : vector<16x1xf32> to vector<16x32xf32>
    %246 = arith.mulf %241, %245 : vector<16x32xf32>
    %247 = vector.broadcast %227 : vector<1x32xf32> to vector<16x32xf32>
    %248 = arith.mulf %246, %247 : vector<16x32xf32>
    %249 = vector.broadcast %228 : vector<1x32xf32> to vector<16x32xf32>
    %250 = arith.addf %248, %249 : vector<16x32xf32>
    %251 = arith.truncf %250 : vector<16x32xf32> to vector<16x32xbf16>
    %c0_139 = arith.constant 0 : index
    %c0_140 = arith.constant 0 : index
    %252 = vector.load %arg13[%c0_139, %c0_140] : memref<32x128xbf16, #tpu.memory_space<vmem>>, vector<32x128xbf16>
    %cst_141 = arith.constant dense<0.000000e+00> : vector<16x128xf32>
    %253 = tpu.matmul %251, %252, %cst_141 {dimension_numbers = #tpu.dot_dimension_numbers<[1], [0], [0], [1], [0, 0, 1, 1], [], []>} : vector<16x32xbf16>, vector<32x128xbf16>, vector<16x128xf32> -> vector<16x128xf32>
    %c0_142 = arith.constant 0 : index
    %c0_143 = arith.constant 0 : index
    %254 = vector.load %arg14[%c0_142, %c0_143] : memref<1x128xf32, #tpu.memory_space<vmem>>, vector<1x128xf32>
    %255 = vector.broadcast %254 : vector<1x128xf32> to vector<16x128xf32>
    %256 = arith.addf %253, %255 : vector<16x128xf32>
    %cst_144 = arith.constant 5.000000e-01 : f32
    %257 = vector.broadcast %cst_144 : f32 to vector<16x128xf32>
    %258 = arith.mulf %257, %256 : vector<16x128xf32>
    %cst_145 = arith.constant 0.707106769 : f32
    %259 = vector.broadcast %cst_145 : f32 to vector<16x128xf32>
    %260 = arith.mulf %256, %259 : vector<16x128xf32>
    %261 = math.erf %260 : vector<16x128xf32>
    %cst_146 = arith.constant 1.000000e+00 : f32
    %262 = vector.broadcast %cst_146 : f32 to vector<16x128xf32>
    %263 = arith.addf %262, %261 : vector<16x128xf32>
    %264 = arith.mulf %258, %263 : vector<16x128xf32>
    %265 = arith.truncf %264 : vector<16x128xf32> to vector<16x128xbf16>
    %c0_147 = arith.constant 0 : index
    %c0_148 = arith.constant 0 : index
    %266 = vector.load %arg15[%c0_147, %c0_148] : memref<128x32xbf16, #tpu.memory_space<vmem>>, vector<128x32xbf16>
    %cst_149 = arith.constant dense<0.000000e+00> : vector<16x32xf32>
    %267 = tpu.matmul %265, %266, %cst_149 {dimension_numbers = #tpu.dot_dimension_numbers<[1], [0], [0], [1], [0, 0, 1, 1], [], []>} : vector<16x128xbf16>, vector<128x32xbf16>, vector<16x32xf32> -> vector<16x32xf32>
    %c0_150 = arith.constant 0 : index
    %c0_151 = arith.constant 0 : index
    %268 = vector.load %arg16[%c0_150, %c0_151] : memref<1x32xf32, #tpu.memory_space<vmem>>, vector<1x32xf32>
    %269 = vector.broadcast %268 : vector<1x32xf32> to vector<16x32xf32>
    %270 = arith.addf %267, %269 : vector<16x32xf32>
    %271 = arith.addf %226, %270 : vector<16x32xf32>
    %272 = vector.shape_cast %271 : vector<16x32xf32> to vector<2x8x32xf32>
    %c0_152 = arith.constant 0 : index
    %c0_153 = arith.constant 0 : index
    %c0_154 = arith.constant 0 : index
    %273 = vector.load %arg17[%c0_152, %c0_153, %c0_154] : memref<2x8x32xf32, #tpu.memory_space<vmem>>, vector<2x8x32xf32>
    tpu.vector_store %arg17[%c0_152, %c0_153, %c0_154], %272 {strides = array<i32>} : memref<2x8x32xf32, #tpu.memory_space<vmem>>, vector<2x8x32xf32>,
    return
  }
}

</mosaic_0001>

<bundles_post_ra>
// kernel: tpu_custom_call.1
= control target key start
LH: loop header
LB: loop body
LE: loop exit
PB: predicated region body
PF: predicated region fallthrough
CT: control target
= control target key end

     0   :  { %s3367_s0 = inlined_call_operand.vmem [shape: f32[2,8,32], index: 0, kind: input, shape index: {}]   ;;  %s3368_s1 = inlined_call_operand.vmem [shape: f32[1,32], index: 1, kind: input, shape index: {}]   ;;  %s3369_s2 = inlined_call_operand.vmem [shape: f32[1,32], index: 2, kind: input, shape index: {}]   ;;  %s3370_s3 = inlined_call_operand.vmem [shape: bf16[4,32,8], index: 3, kind: input, shape index: {}]   ;;  %s3371_s4 = inlined_call_operand.vmem [shape: bf16[4,32,8], index: 4, kind: input, shape index: {}]   ;;  %s3372_s5 = inlined_call_operand.vmem [shape: bf16[4,32,8], index: 5, kind: input, shape index: {}]   ;;  %s3373_s6 = inlined_call_operand.vmem [shape: f32[4,1,8], index: 6, kind: input, shape index: {}]   ;;  %s3374_s7 = inlined_call_operand.vmem [shape: f32[4,1,8], index: 7, kind: input, shape index: {}]   ;;  %s3375_s8 = inlined_call_operand.vmem [shape: f32[4,1,8], index: 8, kind: input, shape index: {}]   ;;  %s3376_s9 = inlined_call_operand.vmem [shape: bf16[4,8,32], index: 9, kind: input, shape index: {}]   ;;  %s3377_s10 = inlined_call_operand.vmem [shape: f32[1,32], index: 10, kind: input, shape index: {}]   ;;  %s3378_s11 = inlined_call_operand.vmem [shape: f32[1,32], index: 11, kind: input, shape index: {}]   ;;  %s3379_s12 = inlined_call_operand.vmem [shape: f32[1,32], index: 12, kind: input, shape index: {}]   ;;  %s3380_s13 = inlined_call_operand.vmem [shape: bf16[32,128], index: 13, kind: input, shape index: {}]   ;;  %s3381_s14 = inlined_call_operand.vmem [shape: f32[1,128], index: 14, kind: input, shape index: {}]   ;;  %s3382_s15 = inlined_call_operand.vmem [shape: bf16[128,32], index: 15, kind: input, shape index: {}]   ;;  %s3383_s16 = inlined_call_operand.vmem [shape: f32[1,32], index: 16, kind: input, shape index: {}]   ;;  %s3384_s17 = inlined_call_operand.hbm [shape: f32[2,8,32], index: 17, kind: output, shape index: {}]  }
   0x1   :  { %3386 = sst [smem:[#allocation5_spill]] %s3367_s0 }
   0x2   :  { %3387 = sst [smem:[#allocation6_spill]] %s3368_s1 }
   0x3   :  { %s3388_s26 = sld [smem:[#allocation5_spill]]  ;;  %vm62_vm0 = vcmask 261120  }
   0x9   :  { %v58_v0 = vld [vmem:[%s3388_s26] sm:$0xff]  ;;  %v59_v1 = vld [vmem:[%s3388_s26 + $0x8] sm:$0xff] }
   0xa   :  { %v63_v2 = vsel %vm62_vm0, %v58_v0, 0.0  ;;  %v66_v3 = vsel %vm62_vm0, %v59_v1, 0.0 }
   0xb   :  { %64 = vadd.xlane.f32.xlu0 %v63_v2 }
   0xf   :  { %67 = vadd.xlane.f32.xlu0 %v66_v3 }
  0x10   :  { %22 = vsyncpa [#allocation3], 0  ;;  %v2707_v14 = vld [vmem:[%s3370_s3] sm:$0xff]   ;;  %v2811_v15 = vmov 0.0   ;;  %v2708_v16 = vld [vmem:[%s3370_s3 + $0x8] sm:$0xff]   ;;  %vm2812_vm1 = vmmov 0  }
  0x11   :  { %2458 = vmatprep.subr.bf16.mxu0 %v2811_v15  ;;  %2482 = vmatprep.subr.bf16.mxu1 %v2811_v15  ;;  %s3389_s20 = sld [smem:[#allocation6_spill]]  ;;  %v2237_v29 = vld [vmem:[%s3369_s2] ss:$0 sm:$0xff]  ;;  %v2710_v35 = vld [vmem:[%s3371_s4 + $0x8] sm:$0xff]   ;;  %vm313_vm2 = vcmask 64512   ;;  %vm435_vm3 = vcmask 1043456  }
  0x12   :  { %2459 = vmatpush3.bf16.msra.mxu0 %v2707_v14  ;;  %2462 = vmatprep.mubr.msk.bf16.mxu0 %vm2812_vm1, %v2811_v15  ;;  %v2709_v33 = vld [vmem:[%s3371_s4] sm:$0xff]   ;;  %v2712_v37 = vld [vmem:[%s3372_s5 + $0x8] sm:$0xff]   ;;  %s2813_s22 = smov [#allocation2]  }
  0x13   :  { %2460 = vmatprep.subr.bf16.mxu0 %v2811_v15  ;;  %2484 = vmatprep.mubr.msk.bf16.mxu1 %vm2812_vm1, %v2811_v15  ;;  %v2711_v36 = vld [vmem:[%s3372_s5] sm:$0xff]  }
  0x14   :  { %v2242_v42 = vld [vmem:[%s3374_s7] ss:$0 sm:$0xff] }
  0x15   :  { %v2238_v50 = vld [vmem:[%s3373_s6] ss:$0 sm:$0xff] }
  0x16   :  { %2461 = vmatpush3.bf16.msra.mxu0 %v2708_v16  ;;  %v2246_v53 = vld [vmem:[%s3375_s8] ss:$0 sm:$0xff] }
  0x17   :  { %2466 = vmatprep.subr.bf16.mxu0 %v2811_v15  ;;  %v2236_v25 = vld [vmem:[%s3389_s20] ss:$0 sm:$0xff] }
  0x98   :  { %v65_v4 = vpop.xlane.xlu0 %64 }
  0x99   :  { %v70_v5 = vmul.f32 0.03125, %v65_v4 }
  0x9b   :  { %v72_v6 = vsub.f32 %v58_v0, %v70_v5  ;;  %v107_v5 = vlaneseq }
  0x9c   :  { %v68_v7 = vpop.xlane.xlu0 %67 }
  0x9d   :  { %v71_v8 = vmul.f32 0.03125, %v68_v7  ;;  %v74_v9 = vmul.f32 %v72_v6, %v72_v6  ;;  %v110_v7 = vand.u32 127, %v107_v5 }
  0x9f   :  { %v73_v10 = vsub.f32 %v59_v1, %v71_v8  ;;  %v76_v11 = vsel %vm62_vm0, %v74_v9, 0.0 }
  0xa0   :  { %77 = vadd.xlane.f32.xlu1 %v76_v11 }
  0xa1   :  { %v75_v12 = vmul.f32 %v73_v10, %v73_v10 }
  0xa3   :  { %v79_v13 = vsel %vm62_vm0, %v75_v12, 0.0 }
  0xa4   :  { %80 = vadd.xlane.f32.xlu1 %v79_v13 }
 0x12d   :  { %v78_v17 = vpop.xlane.xlu1 %77 }
 0x12e   :  { %v82_v18 = vmul.f32 0.03125, %v78_v17 }
 0x130   :  { %v84_v19 = vadd.f32 1e-05, %v82_v18 }
 0x131   :  { %v81_v20 = vpop.xlane.xlu1 %80 }
 0x132   :  { %2741 = vrsqrt.f32 %v84_v19  ;;  %v83_v21 = vmul.f32 0.03125, %v81_v20 }
 0x134   :  { %v85_v22 = vadd.f32 1e-05, %v83_v21 }
 0x136   :  { %2743 = vrsqrt.f32 %v85_v22 }
 0x13c   :  { %v2742_v23 = vpop.eup %2741 }
 0x13d   :  { %v88_v24 = vmul.f32 %v2742_v23, %v72_v6  ;;  %v108_v6 = vshrl.u32 %v107_v5, 7  ;;  %v2277_v5 = vld [vmem:[%s3375_s8 + $0x1] ss:$0 sm:$0xff] }
 0x13f   :  { %v96_v27 = vmul.f32 %v2236_v25, %v88_v24  ;;  %vm2989_vm4 = vcmp.le.s32.totalorder %v110_v7, %v108_v6 }
 0x140   :  { %v2744_v26 = vpop.eup %2743 }
 0x141   :  { %v89_v28 = vmul.f32 %v2744_v26, %v73_v10  ;;  %v104_v31 = vadd.f32 %v2237_v29, %v96_v27 }
 0x143   :  { %v97_v30 = vmul.f32 %v2236_v25, %v89_v28 }
 0x145   :  { %v105_v32 = vadd.f32 %v2237_v29, %v97_v30 }
 0x147   :  { %v2939_v34 = vpack.c.bf16 %v105_v32, %v104_v31 }
 0x149   :  { %2463 = vmatmul.mubr.msk.bf16.vlgmr.msra.gmra.mrb[0].mxu0 %vm62_vm0, %v2939_v34 }
 0x14a   :  { %2467 = vmatpush3.bf16.msra.mxu0 %v2709_v33  ;;  %2470 = vmatprep.mubr.msk.bf16.mxu0 %vm2812_vm1, %v2811_v15 }
 0x14b   :  { %2468 = vmatprep.subr.bf16.mxu0 %v2811_v15 }
 0x14e   :  { %2469 = vmatpush3.bf16.msra.mxu0 %v2710_v35 }
 0x14f   :  { %2474 = vmatprep.subr.bf16.mxu0 %v2811_v15 }
 0x151   :  { %2471 = vmatmul.mubr.msk.bf16.vlgmr.msra.gmra.mrb[4].mxu0 %vm62_vm0, %v2939_v34 }
 0x152   :  { %2475 = vmatpush3.bf16.msra.mxu0 %v2711_v36  ;;  %2478 = vmatprep.mubr.msk.bf16.mxu0 %vm2812_vm1, %v2811_v15 }
 0x153   :  { %2476 = vmatprep.subr.bf16.mxu0 %v2811_v15 }
 0x156   :  { %2477 = vmatpush3.bf16.msra.mxu0 %v2712_v37 }
 0x157   :  { %2488 = vmatprep.subr.bf16.mxu0 %v2811_v15 }
 0x159   :  { %2479 = vmatmul.mubr.msk.bf16.vlgmr.msra.gmra.mrb[8].mxu0 %vm62_vm0, %v2939_v34 }
 0x15a   :  { %2490 = vmatprep.mubr.msk.bf16.mxu0 %vm2812_vm1, %v2811_v15 }
 0x21c   :  { %v172_v38 = vpop.f32.mrb[0].mxu0 }
 0x21d   :  { %v2464_v39 = vpop.f32.mrb[1].mxu0  ;;  %v173_v54 = vadd.f32 %v2238_v50, %v172_v38  ;;  %v2713_v38 = vld [vmem:[%s3370_s3 + $0x10] sm:$0xff]  }
 0x21e   :  { %v175_v40 = vpop.f32.mrb[2].mxu0 }
 0x21f   :  { %v2465_v41 = vpop.f32.mrb[3].mxu0  ;;  %v176_v57 = vadd.f32 %v2238_v50, %v175_v40  ;;  %v307_v61 = vpack.c.bf16 %v173_v54, %v173_v54 }
 0x220   :  { %v2714_v41 = vld [vmem:[%s3371_s4 + $0x10] sm:$0xff]  }
 0x221   :  { %v308_v1 = vpack.c.bf16 %v176_v57, %v176_v57  ;;  %v2268_v57 = vld [vmem:[%s3374_s7 + $0x1] ss:$0 sm:$0xff] }
 0x224   :  { %v236_v43 = vpop.f32.mrb[4].mxu0 }
 0x225   :  { %v237_v44 = vadd.f32 %v2242_v42, %v236_v43  ;;  %v2472_v45 = vpop.f32.mrb[5].mxu0  ;;  %v2715_v43 = vld [vmem:[%s3370_s3 + $0x18] sm:$0xff]  }
 0x226   :  { %v239_v46 = vpop.f32.mrb[6].mxu0  ;;  %v2717_v45 = vld [vmem:[%s3372_s5 + $0x10] sm:$0xff]  }
 0x227   :  { %v309_v47 = vpack.c.bf16 %v237_v44, %v237_v44  ;;  %v240_v48 = vadd.f32 %v2242_v42, %v239_v46  ;;  %v2473_v49 = vpop.f32.mrb[7].mxu0  ;;  %v2716_v44 = vld [vmem:[%s3371_s4 + $0x18] sm:$0xff]  }
 0x228   :  { %v2718_v46 = vld [vmem:[%s3372_s5 + $0x18] sm:$0xff]  }
 0x229   :  { %v310_v51 = vpack.c.bf16 %v240_v48, %v240_v48  ;;  %v318_v52 = vsel %vm313_vm2, %v309_v47, 0 }
 0x22a   :  { %2483 = vmatpush3.bf16.xpose.msra.mxu1 %v318_v52 }
 0x22b   :  { %v364_v55 = vsel %vm313_vm2, %v310_v51, 0  ;;  %2494 = vmatprep.subr.bf16.mxu1 %v2811_v15 }
 0x22c   :  { %v300_v56 = vpop.f32.mrb[8].mxu0  ;;  %2489 = vmatpush3.bf16.xpose.msra.mxu0 %v364_v55 }
 0x22d   :  { %v301_v58 = vadd.f32 %v2246_v53, %v300_v56  ;;  %v2480_v59 = vpop.f32.mrb[9].mxu0  ;;  %2500 = vmatprep.subr.bf16.mxu0 %v2811_v15 }
 0x22e   :  { %v303_v60 = vpop.f32.mrb[10].mxu0 }
 0x22f   :  { %v311_v62 = vpack.c.bf16 %v301_v58, %v301_v58  ;;  %v304_v63 = vadd.f32 %v2246_v53, %v303_v60  ;;  %v2481_v0 = vpop.f32.mrb[11].mxu0 }
 0x231   :  { %v437_v2 = vsel %vm435_vm3, %v311_v62, 0  ;;  %v312_v3 = vpack.c.bf16 %v304_v63, %v304_v63  ;;  %2485 = vmatmul.mubr.msk.bf16.vlgmr.msra.gmra.mrb[0].mxu1 %vm313_vm2, %v307_v61 }
 0x232   :  { %2495 = vmatpush3.bf16.msra.mxu1 %v437_v2  ;;  %2496 = vmatprep.mubr.msk.bf16.mxu1 %vm2812_vm1, %v2811_v15 }
 0x233   :  { %v483_v4 = vsel %vm435_vm3, %v312_v3, 0  ;;  %2491 = vmatmul.mubr.msk.bf16.vlgmr.msra.gmra.mrb[12].mxu0 %vm313_vm2, %v308_v1  ;;  %2506 = vmatprep.subr.bf16.mxu1 %v2811_v15 }
 0x234   :  { %2501 = vmatpush3.bf16.msra.mxu0 %v483_v4  ;;  %2502 = vmatprep.mubr.msk.bf16.mxu0 %vm2812_vm1, %v2811_v15  ;;  %v2259_v4 = vld [vmem:[%s3373_s6 + $0x1] ss:$0 sm:$0xff] }
 0x235   :  { %2514 = vmatprep.subr.bf16.mxu0 %v2811_v15 }
 0x304   :  { %v354_v9 = vpop.f32.mrb[0].mxu1 }
 0x305   :  { %v406_v10 = vsel %vm2989_vm4, %v354_v9, -1e+30  ;;  %v2486_v11 = vpop.f32.mrb[1].mxu1 }
 0x306   :  { %v357_v12 = vpop.f32.mrb[2].mxu1  ;;  %v400_v13 = vpop.f32.mrb[12].mxu0  ;;  %v408_v14 = vsel %vm313_vm2, %v406_v10, -inf }
 0x307   :  { %v407_v16 = vsel %vm2989_vm4, %v400_v13, -1e+30  ;;  %409 = vmax.xlane.f32.xlu1 %v408_v14  ;;  %v2487_v17 = vpop.f32.mrb[3].mxu1  ;;  %v2492_v18 = vpop.f32.mrb[13].mxu0 }
 0x308   :  { %v403_v19 = vpop.f32.mrb[14].mxu0  ;;  %v411_v20 = vsel %vm313_vm2, %v407_v16, -inf }
 0x309   :  { %412 = vmax.xlane.f32.xlu0 %v411_v20  ;;  %v2493_v21 = vpop.f32.mrb[15].mxu0 }
 0x394   :  { %v410_v22 = vpop.xlane.xlu1 %409 }
 0x395   :  { %v414_v23 = vsub.f32 %v406_v10, %v410_v22 }
 0x396   :  { %v413_v24 = vpop.xlane.xlu0 %412 }
 0x397   :  { %v416_v25 = vmul.f32 1.442695, %v414_v23  ;;  %v415_v26 = vsub.f32 %v407_v16, %v413_v24 }
 0x399   :  { %2745 = vpow2.f32 %v416_v25  ;;  %v418_v27 = vmul.f32 1.442695, %v415_v26 }
 0x39b   :  { %2747 = vpow2.f32 %v418_v27 }
 0x3a3   :  { %v2746_v28 = vpop.eup %2745 }
 0x3a4   :  { %v420_v29 = vsel %vm313_vm2, %v2746_v28, 0.0 }
 0x3a5   :  { %v2748_v30 = vpop.eup %2747  ;;  %421 = vadd.xlane.f32.xlu1 %v420_v29 }
 0x3a6   :  { %v423_v31 = vsel %vm313_vm2, %v2748_v30, 0.0 }
 0x3a7   :  { %424 = vadd.xlane.f32.xlu0 %v423_v31 }
 0x432   :  { %v422_v32 = vpop.xlane.xlu1 %421 }
 0x433   :  { %2749 = vrcp.f32 %v422_v32 }
 0x434   :  { %v425_v33 = vpop.xlane.xlu0 %424 }
 0x435   :  { %2751 = vrcp.f32 %v425_v33 }
 0x43d   :  { %v2750_v35 = vpop.eup %2749 }
 0x43e   :  { %v428_v36 = vmul.f32 %v2750_v35, %v2746_v28 }
 0x43f   :  { %v2752_v37 = vpop.eup %2751 }
 0x440   :  { %v429_v39 = vmul.f32 %v2752_v37, %v2748_v30  ;;  %v430_v40 = vpack.c.bf16 %v428_v36, %v428_v36 }
 0x442   :  { %2497 = vmatmul.mubr.msk.bf16.vlgmr.msra.gmra.mrb[4].mxu1 %vm313_vm2, %v430_v40  ;;  %v431_v42 = vpack.c.bf16 %v429_v39, %v429_v39 }
 0x443   :  { %2507 = vmatpush3.bf16.msra.mxu1 %v2713_v38  ;;  %2510 = vmatprep.mubr.msk.bf16.mxu1 %vm2812_vm1, %v2811_v15 }
 0x444   :  { %2503 = vmatmul.mubr.msk.bf16.vlgmr.msra.gmra.mrb[16].mxu0 %vm313_vm2, %v431_v42  ;;  %2508 = vmatprep.subr.bf16.mxu1 %v2811_v15 }
 0x445   :  { %2515 = vmatpush3.bf16.msra.mxu0 %v2714_v41  ;;  %2518 = vmatprep.mubr.msk.bf16.mxu0 %vm2812_vm1, %v2811_v15 }
 0x446   :  { %2516 = vmatprep.subr.bf16.mxu0 %v2811_v15 }
 0x447   :  { %2509 = vmatpush3.bf16.msra.mxu1 %v2715_v43 }
 0x448   :  { %2522 = vmatprep.subr.bf16.mxu1 %v2811_v15 }
 0x449   :  { %2517 = vmatpush3.bf16.msra.mxu0 %v2716_v44 }
 0x44a   :  { %2511 = vmatmul.mubr.msk.bf16.vlgmr.msra.gmra.mrb[8].mxu1 %vm62_vm0, %v2939_v34  ;;  %2530 = vmatprep.subr.bf16.mxu0 %v2811_v15 }
 0x44b   :  { %2523 = vmatpush3.bf16.msra.mxu1 %v2717_v45  ;;  %2526 = vmatprep.mubr.msk.bf16.mxu1 %vm2812_vm1, %v2811_v15 }
 0x44c   :  { %2519 = vmatmul.mubr.msk.bf16.vlgmr.msra.gmra.mrb[20].mxu0 %vm62_vm0, %v2939_v34  ;;  %2524 = vmatprep.subr.bf16.mxu1 %v2811_v15 }
 0x44d   :  { %2532 = vmatprep.mubr.msk.bf16.mxu0 %vm2812_vm1, %v2811_v15 }
 0x44f   :  { %2525 = vmatpush3.bf16.msra.mxu1 %v2718_v46 }
 0x450   :  { %2536 = vmatprep.subr.bf16.mxu1 %v2811_v15 }
 0x452   :  { %2527 = vmatmul.mubr.msk.bf16.vlgmr.msra.gmra.mrb[12].mxu1 %vm62_vm0, %v2939_v34 }
 0x453   :  { %2538 = vmatprep.mubr.msk.bf16.mxu1 %vm2812_vm1, %v2811_v15 }
 0x515   :  { %v3043_v47 = vpop.f32.mrb[4].mxu1 }
 0x516   :  { %v2498_v48 = vpop.f32.mrb[5].mxu1 }
 0x517   :  { %v476_v49 = vpop.f32.mrb[6].mxu1  ;;  %v3045_v50 = vpop.f32.mrb[16].mxu0 }
 0x518   :  { %v525_v51 = vpack.c.bf16 %v3045_v50, %v3043_v47  ;;  %v2499_v52 = vpop.f32.mrb[7].mxu1  ;;  %v2504_v53 = vpop.f32.mrb[17].mxu0 }
 0x519   :  { %v522_v54 = vpop.f32.mrb[18].mxu0 }
 0x51a   :  { %v2505_v55 = vpop.f32.mrb[19].mxu0  ;;  %v2285_v54 = vld [vmem:[%s3376_s9 + $0x4] sm:$0xf] }
 0x51d   :  { %v586_v56 = vpop.f32.mrb[8].mxu1 }
 0x51e   :  { %v2512_v58 = vpop.f32.mrb[9].mxu1  ;;  %v587_v10 = vadd.f32 %v2259_v4, %v586_v56 }
 0x51f   :  { %v589_v59 = vpop.f32.mrb[10].mxu1  ;;  %v652_v60 = vpop.f32.mrb[20].mxu0 }
 0x520   :  { %v653_v61 = vadd.f32 %v2268_v57, %v652_v60  ;;  %v2513_v62 = vpop.f32.mrb[11].mxu1  ;;  %v2520_v63 = vpop.f32.mrb[21].mxu0  ;;  %v590_v16 = vadd.f32 %v2259_v4, %v589_v59  ;;  %v725_v20 = vpack.c.bf16 %v587_v10, %v587_v10  ;;  %v948_v60 = vsel %vm435_vm3, %v2285_v54, 0 }
 0x521   :  { %v655_v0 = vpop.f32.mrb[22].mxu0  ;;  %v2719_v63 = vld [vmem:[%s3371_s4 + $0x20] sm:$0xff]  }
 0x522   :  { %v727_v1 = vpack.c.bf16 %v653_v61, %v653_v61  ;;  %v656_v2 = vadd.f32 %v2268_v57, %v655_v0  ;;  %v2521_v3 = vpop.f32.mrb[23].mxu0  ;;  %v726_v22 = vpack.c.bf16 %v590_v16, %v590_v16  ;;  %v526_v57 = vld [vmem:[%s3376_s9] sm:$0xf]  ;;  %v2720_v0 = vld [vmem:[%s3371_s4 + $0x28] sm:$0xff]  }
 0x523   :  { %v995_v62 = vsel %vm435_vm3, %v526_v57, 0  ;;  %v2724_v16 = vld [vmem:[%s3372_s5 + $0x28] sm:$0xff]  }
 0x524   :  { %v735_v6 = vsel %vm313_vm2, %v727_v1, 0  ;;  %v728_v7 = vpack.c.bf16 %v656_v2, %v656_v2  ;;  %v2721_v2 = vld [vmem:[%s3370_s3 + $0x20] sm:$0xff]  }
 0x525   :  { %v718_v9 = vpop.f32.mrb[12].mxu1  ;;  %2531 = vmatpush3.bf16.xpose.msra.mxu0 %v735_v6 }
 0x526   :  { %v781_v11 = vsel %vm313_vm2, %v728_v7, 0  ;;  %v719_v12 = vadd.f32 %v2277_v5, %v718_v9  ;;  %v2528_v13 = vpop.f32.mrb[13].mxu1  ;;  %2542 = vmatprep.subr.bf16.mxu0 %v2811_v15  ;;  %v2722_v9 = vld [vmem:[%s3370_s3 + $0x28] sm:$0xff]  }
 0x527   :  { %v721_v14 = vpop.f32.mrb[14].mxu1  ;;  %2537 = vmatpush3.bf16.xpose.msra.mxu1 %v781_v11  ;;  %v2723_v11 = vld [vmem:[%s3372_s5 + $0x20] sm:$0xff]  }
 0x528   :  { %v729_v17 = vpack.c.bf16 %v719_v12, %v719_v12  ;;  %v722_v18 = vadd.f32 %v2277_v5, %v721_v14  ;;  %v2529_v19 = vpop.f32.mrb[15].mxu1  ;;  %2548 = vmatprep.subr.bf16.mxu1 %v2811_v15 }
 0x52a   :  { %v730_v21 = vpack.c.bf16 %v722_v18, %v722_v18  ;;  %v853_v23 = vsel %vm435_vm3, %v729_v17, 0  ;;  %v2302_v17 = vld [vmem:[%s3374_s7 + $0x2] ss:$0 sm:$0xff] }
 0x52c   :  { %2533 = vmatmul.mubr.msk.bf16.vlgmr.msra.gmra.mrb[24].mxu0 %vm313_vm2, %v725_v20  ;;  %v899_v24 = vsel %vm435_vm3, %v730_v21, 0 }
 0x52d   :  { %2543 = vmatpush3.bf16.msra.mxu0 %v853_v23  ;;  %2544 = vmatprep.mubr.msk.bf16.mxu0 %vm2812_vm1, %v2811_v15 }
 0x52e   :  { %2539 = vmatmul.mubr.msk.bf16.vlgmr.msra.gmra.mrb[16].mxu1 %vm313_vm2, %v726_v22  ;;  %2554 = vmatprep.subr.bf16.mxu0 %v2811_v15 }
 0x52f   :  { %2549 = vmatpush3.bf16.msra.mxu1 %v899_v24  ;;  %2550 = vmatprep.mubr.msk.bf16.mxu1 %vm2812_vm1, %v2811_v15 }
 0x530   :  { %2560 = vmatprep.subr.bf16.mxu1 %v2811_v15 }
 0x5ff   :  { %v771_v25 = vpop.f32.mrb[24].mxu0 }
 0x600   :  { %v823_v26 = vsel %vm2989_vm4, %v771_v25, -1e+30  ;;  %v2534_v27 = vpop.f32.mrb[25].mxu0 }
 0x601   :  { %v774_v28 = vpop.f32.mrb[26].mxu0  ;;  %v817_v29 = vpop.f32.mrb[16].mxu1  ;;  %v825_v30 = vsel %vm313_vm2, %v823_v26, -inf }
 0x602   :  { %v824_v31 = vsel %vm2989_vm4, %v817_v29, -1e+30  ;;  %v2540_v32 = vpop.f32.mrb[17].mxu1  ;;  %826 = vmax.xlane.f32.xlu0 %v825_v30  ;;  %v2535_v33 = vpop.f32.mrb[27].mxu0 }
 0x603   :  { %v820_v35 = vpop.f32.mrb[18].mxu1  ;;  %v828_v36 = vsel %vm313_vm2, %v824_v31, -inf }
 0x604   :  { %829 = vmax.xlane.f32.xlu1 %v828_v36  ;;  %v2541_v37 = vpop.f32.mrb[19].mxu1  ;;  %v2293_v35 = vld [vmem:[%s3373_s6 + $0x2] ss:$0 sm:$0xff] }
 0x68f   :  { %v827_v38 = vpop.xlane.xlu0 %826 }
 0x690   :  { %v831_v39 = vsub.f32 %v823_v26, %v827_v38 }
 0x691   :  { %v830_v40 = vpop.xlane.xlu1 %829 }
 0x692   :  { %v833_v41 = vmul.f32 1.442695, %v831_v39  ;;  %v832_v42 = vsub.f32 %v824_v31, %v830_v40 }
 0x694   :  { %2753 = vpow2.f32 %v833_v41  ;;  %v835_v43 = vmul.f32 1.442695, %v832_v42 }
 0x696   :  { %2755 = vpow2.f32 %v835_v43 }
 0x69e   :  { %v2754_v44 = vpop.eup %2753 }
 0x69f   :  { %v837_v45 = vsel %vm313_vm2, %v2754_v44, 0.0 }
 0x6a0   :  { %v2756_v46 = vpop.eup %2755  ;;  %838 = vadd.xlane.f32.xlu0 %v837_v45 }
 0x6a1   :  { %v840_v48 = vsel %vm313_vm2, %v2756_v46, 0.0 }
 0x6a2   :  { %841 = vadd.xlane.f32.xlu1 %v840_v48 }
 0x72d   :  { %v839_v49 = vpop.xlane.xlu0 %838 }
 0x72e   :  { %2757 = vrcp.f32 %v839_v49 }
 0x72f   :  { %v842_v52 = vpop.xlane.xlu1 %841 }
 0x730   :  { %2759 = vrcp.f32 %v842_v52 }
 0x738   :  { %v2758_v53 = vpop.eup %2757 }
 0x739   :  { %v845_v55 = vmul.f32 %v2758_v53, %v2754_v44  ;;  %v2311_v44 = vld [vmem:[%s3375_s8 + $0x2] ss:$0 sm:$0xff] }
 0x73a   :  { %v2760_v56 = vpop.eup %2759 }
 0x73b   :  { %v846_v58 = vmul.f32 %v2760_v56, %v2756_v46  ;;  %v847_v59 = vpack.c.bf16 %v845_v55, %v845_v55 }
 0x73d   :  { %2545 = vmatmul.mubr.msk.bf16.vlgmr.msra.gmra.mrb[28].mxu0 %vm313_vm2, %v847_v59  ;;  %v848_v61 = vpack.c.bf16 %v846_v58, %v846_v58 }
 0x73e   :  { %2555 = vmatpush3.bf16.msra.mxu0 %v948_v60  ;;  %2556 = vmatprep.mubr.msk.bf16.mxu0 %vm2812_vm1, %v2811_v15 }
 0x73f   :  { %2551 = vmatmul.mubr.msk.bf16.vlgmr.msra.gmra.mrb[20].mxu1 %vm313_vm2, %v848_v61  ;;  %2566 = vmatprep.subr.bf16.mxu0 %v2811_v15 }
 0x740   :  { %2561 = vmatpush3.bf16.msra.mxu1 %v995_v62  ;;  %2562 = vmatprep.mubr.msk.bf16.mxu1 %vm2812_vm1, %v2811_v15 }
 0x741   :  { %2574 = vmatprep.subr.bf16.mxu1 %v2811_v15 }
 0x747   :  { %2563 = vmatmul.mubr.msk.bf16.vlgmr.msra.gmra.mrb[24].mxu1 %vm313_vm2, %v525_v51 }
 0x748   :  { %2575 = vmatpush3.bf16.msra.mxu1 %v2719_v63  ;;  %2578 = vmatprep.mubr.msk.bf16.mxu1 %vm2812_vm1, %v2811_v15 }
 0x749   :  { %2576 = vmatprep.subr.bf16.mxu1 %v2811_v15 }
 0x74c   :  { %2577 = vmatpush3.bf16.msra.mxu1 %v2720_v0 }
 0x74d   :  { %2590 = vmatprep.subr.bf16.mxu1 %v2811_v15 }
 0x74f   :  { %2579 = vmatmul.mubr.msk.bf16.vlgmr.msra.gmra.mrb[28].mxu1 %vm62_vm0, %v2939_v34 }
 0x750   :  { %2592 = vmatprep.mubr.msk.bf16.mxu1 %vm2812_vm1, %v2811_v15 }
 0x810   :  { %v889_v47 = vpop.f32.mrb[28].mxu0 }
 0x811   :  { %v2546_v50 = vpop.f32.mrb[29].mxu0 }
 0x812   :  { %v892_v51 = vpop.f32.mrb[30].mxu0  ;;  %v935_v1 = vpop.f32.mrb[20].mxu1 }
 0x813   :  { %v941_v3 = vpack.c.bf16 %v935_v1, %v889_v47  ;;  %v2547_v4 = vpop.f32.mrb[31].mxu0  ;;  %v2552_v5 = vpop.f32.mrb[21].mxu1 }
 0x814   :  { %v938_v6 = vpop.f32.mrb[22].mxu1 }
 0x815   :  { %v2553_v7 = vpop.f32.mrb[23].mxu1  ;;  %2557 = vmatmul.mubr.msk.bf16.vlgmr.msra.gmra.mrb[32].mxu0 %vm313_vm2, %v941_v3 }
 0x816   :  { %2567 = vmatpush3.bf16.msra.mxu0 %v2721_v2  ;;  %2570 = vmatprep.mubr.msk.bf16.mxu0 %vm2812_vm1, %v2811_v15 }
 0x817   :  { %2568 = vmatprep.subr.bf16.mxu0 %v2811_v15 }
 0x81a   :  { %2569 = vmatpush3.bf16.msra.mxu0 %v2722_v9  ;;  %v1031_v10 = vpop.f32.mrb[24].mxu1 }
 0x81b   :  { %v2564_v12 = vpop.f32.mrb[25].mxu1  ;;  %2582 = vmatprep.subr.bf16.mxu0 %v2811_v15 }
 0x81c   :  { %v1034_v13 = vpop.f32.mrb[26].mxu1 }
 0x81d   :  { %v2565_v14 = vpop.f32.mrb[27].mxu1  ;;  %2571 = vmatmul.mubr.msk.bf16.vlgmr.msra.gmra.mrb[36].mxu0 %vm62_vm0, %v2939_v34 }
 0x81e   :  { %2583 = vmatpush3.bf16.msra.mxu0 %v2723_v11  ;;  %2586 = vmatprep.mubr.msk.bf16.mxu0 %vm2812_vm1, %v2811_v15 }
 0x81f   :  { %2584 = vmatprep.subr.bf16.mxu0 %v2811_v15 }
 0x822   :  { %2585 = vmatpush3.bf16.msra.mxu0 %v2724_v16  ;;  %v1163_v18 = vpop.f32.mrb[28].mxu1 }
 0x823   :  { %v1164_v19 = vadd.f32 %v2302_v17, %v1163_v18  ;;  %v2580_v20 = vpop.f32.mrb[29].mxu1  ;;  %2596 = vmatprep.subr.bf16.mxu0 %v2811_v15  ;;  %v2319_v18 = vld [vmem:[%s3376_s9 + $0x8] sm:$0xf] }
 0x824   :  { %v1166_v21 = vpop.f32.mrb[30].mxu1 }
 0x825   :  { %v1238_v22 = vpack.c.bf16 %v1164_v19, %v1164_v19  ;;  %v1167_v23 = vadd.f32 %v2302_v17, %v1166_v21  ;;  %v2581_v24 = vpop.f32.mrb[31].mxu1  ;;  %2587 = vmatmul.mubr.msk.bf16.vlgmr.msra.gmra.mrb[40].mxu0 %vm62_vm0, %v2939_v34 }
 0x826   :  { %2598 = vmatprep.mubr.msk.bf16.mxu0 %vm2812_vm1, %v2811_v15  ;;  %v2725_v24 = vld [vmem:[%s3370_s3 + $0x30] sm:$0xff]  }
 0x827   :  { %v1246_v25 = vsel %vm313_vm2, %v1238_v22, 0  ;;  %v1239_v26 = vpack.c.bf16 %v1167_v23, %v1167_v23  ;;  %v1459_v23 = vsel %vm435_vm3, %v2319_v18, 0 }
 0x828   :  { %2591 = vmatpush3.bf16.xpose.msra.mxu1 %v1246_v25 }
 0x829   :  { %v1292_v27 = vsel %vm313_vm2, %v1239_v26, 0  ;;  %2602 = vmatprep.subr.bf16.mxu1 %v2811_v15  ;;  %v2726_v26 = vld [vmem:[%s3370_s3 + $0x38] sm:$0xff]  }
 0x82b   :  { %2597 = vmatpush3.bf16.xpose.msra.mxu0 %v1292_v27  ;;  %v2727_v27 = vld [vmem:[%s3372_s5 + $0x30] sm:$0xff]  }
 0x82c   :  { %2608 = vmatprep.subr.bf16.mxu0 %v2811_v15 }
 0x8e8   :  { %v984_v28 = vpop.f32.mrb[32].mxu0 }
 0x8e9   :  { %v3148_v29 = vadd.f32 %v1031_v10, %v984_v28  ;;  %v2558_v30 = vpop.f32.mrb[33].mxu0  ;;  %v2728_v28 = vld [vmem:[%s3372_s5 + $0x38] sm:$0xff]  }
 0x8ea   :  { %v987_v31 = vpop.f32.mrb[34].mxu0 }
 0x8eb   :  { %v3150_v32 = vadd.f32 %v1034_v13, %v987_v31  ;;  %v2559_v33 = vpop.f32.mrb[35].mxu0 }
 0x8f0   :  { %v1097_v36 = vpop.f32.mrb[36].mxu0 }
 0x8f1   :  { %v1098_v37 = vadd.f32 %v2293_v35, %v1097_v36  ;;  %v2572_v38 = vpop.f32.mrb[37].mxu0  ;;  %v2729_v36 = vld [vmem:[%s3371_s4 + $0x30] sm:$0xff]  }
 0x8f2   :  { %v1100_v39 = vpop.f32.mrb[38].mxu0 }
 0x8f3   :  { %v1236_v40 = vpack.c.bf16 %v1098_v37, %v1098_v37  ;;  %v1101_v41 = vadd.f32 %v2293_v35, %v1100_v39  ;;  %v2573_v42 = vpop.f32.mrb[39].mxu0 }
 0x8f4   :  { %v2730_v42 = vld [vmem:[%s3371_s4 + $0x38] sm:$0xff]  }
 0x8f5   :  { %v1237_v43 = vpack.c.bf16 %v1101_v41, %v1101_v41  ;;  %2593 = vmatmul.mubr.msk.bf16.vlgmr.msra.gmra.mrb[32].mxu1 %vm313_vm2, %v1236_v40 }
 0x8f6   :  { %2604 = vmatprep.mubr.msk.bf16.mxu1 %vm2812_vm1, %v2811_v15 }
 0x8f7   :  { %2599 = vmatmul.mubr.msk.bf16.vlgmr.msra.gmra.mrb[44].mxu0 %vm313_vm2, %v1237_v43 }
 0x8f8   :  { %v1229_v45 = vpop.f32.mrb[40].mxu0  ;;  %2610 = vmatprep.mubr.msk.bf16.mxu0 %vm2812_vm1, %v2811_v15 }
 0x8f9   :  { %v1230_v46 = vadd.f32 %v2311_v44, %v1229_v45  ;;  %v2588_v48 = vpop.f32.mrb[41].mxu0 }
 0x8fa   :  { %v1232_v49 = vpop.f32.mrb[42].mxu0 }
 0x8fb   :  { %v1240_v52 = vpack.c.bf16 %v1230_v46, %v1230_v46  ;;  %v1233_v53 = vadd.f32 %v2311_v44, %v1232_v49  ;;  %v2589_v54 = vpop.f32.mrb[43].mxu0 }
 0x8fd   :  { %v1364_v55 = vsel %vm435_vm3, %v1240_v52, 0  ;;  %v1241_v56 = vpack.c.bf16 %v1233_v53, %v1233_v53 }
 0x8fe   :  { %2603 = vmatpush3.bf16.msra.mxu1 %v1364_v55 }
 0x8ff   :  { %v1410_v57 = vsel %vm435_vm3, %v1241_v56, 0  ;;  %2614 = vmatprep.subr.bf16.mxu1 %v2811_v15 }
 0x900   :  { %2609 = vmatpush3.bf16.msra.mxu0 %v1410_v57 }
 0x901   :  { %2620 = vmatprep.subr.bf16.mxu0 %v2811_v15 }
 0x9c8   :  { %v1282_v58 = vpop.f32.mrb[32].mxu1 }
 0x9c9   :  { %v1334_v59 = vsel %vm2989_vm4, %v1282_v58, -1e+30  ;;  %v2594_v60 = vpop.f32.mrb[33].mxu1 }
 0x9ca   :  { %v1285_v61 = vpop.f32.mrb[34].mxu1  ;;  %v1328_v62 = vpop.f32.mrb[44].mxu0  ;;  %v1336_v63 = vsel %vm313_vm2, %v1334_v59, -inf }
 0x9cb   :  { %v1335_v0 = vsel %vm2989_vm4, %v1328_v62, -1e+30  ;;  %1337 = vmax.xlane.f32.xlu0 %v1336_v63  ;;  %v2595_v47 = vpop.f32.mrb[35].mxu1  ;;  %v2600_v50 = vpop.f32.mrb[45].mxu0  ;;  %v2344_v63 = vld [vmem:[%s3375_s8 + $0x3] ss:$0 sm:$0xff] }
 0x9cc   :  { %v1331_v51 = vpop.f32.mrb[46].mxu0  ;;  %v1339_v1 = vsel %vm313_vm2, %v1335_v0, -inf }
 0x9cd   :  { %1340 = vmax.xlane.f32.xlu1 %v1339_v1  ;;  %v2601_v2 = vpop.f32.mrb[47].mxu0 }
 0xa58   :  { %v1338_v3 = vpop.xlane.xlu0 %1337 }
 0xa59   :  { %v1342_v4 = vsub.f32 %v1334_v59, %v1338_v3 }
 0xa5a   :  { %v1341_v5 = vpop.xlane.xlu1 %1340 }
 0xa5b   :  { %v1344_v6 = vmul.f32 1.442695, %v1342_v4  ;;  %v1343_v7 = vsub.f32 %v1335_v0, %v1341_v5 }
 0xa5d   :  { %2761 = vpow2.f32 %v1344_v6  ;;  %v1346_v9 = vmul.f32 1.442695, %v1343_v7 }
 0xa5f   :  { %2763 = vpow2.f32 %v1346_v9 }
 0xa67   :  { %v2762_v10 = vpop.eup %2761 }
 0xa68   :  { %v1348_v11 = vsel %vm313_vm2, %v2762_v10, 0.0 }
 0xa69   :  { %v2764_v12 = vpop.eup %2763  ;;  %1349 = vadd.xlane.f32.xlu0 %v1348_v11 }
 0xa6a   :  { %v1351_v13 = vsel %vm313_vm2, %v2764_v12, 0.0 }
 0xa6b   :  { %1352 = vadd.xlane.f32.xlu1 %v1351_v13 }
 0xaf6   :  { %v1350_v14 = vpop.xlane.xlu0 %1349 }
 0xaf7   :  { %2765 = vrcp.f32 %v1350_v14 }
 0xaf8   :  { %v1353_v16 = vpop.xlane.xlu1 %1352 }
 0xaf9   :  { %2767 = vrcp.f32 %v1353_v16 }
 0xb01   :  { %v2766_v17 = vpop.eup %2765 }
 0xb02   :  { %v1356_v19 = vmul.f32 %v2766_v17, %v2762_v10 }
 0xb03   :  { %v2768_v20 = vpop.eup %2767 }
 0xb04   :  { %v1357_v21 = vmul.f32 %v2768_v20, %v2764_v12  ;;  %v1358_v22 = vpack.c.bf16 %v1356_v19, %v1356_v19 }
 0xb06   :  { %2605 = vmatmul.mubr.msk.bf16.vlgmr.msra.gmra.mrb[36].mxu1 %vm313_vm2, %v1358_v22  ;;  %v1359_v25 = vpack.c.bf16 %v1357_v21, %v1357_v21 }
 0xb07   :  { %2615 = vmatpush3.bf16.msra.mxu1 %v1459_v23  ;;  %2616 = vmatprep.mubr.msk.bf16.mxu1 %vm2812_vm1, %v2811_v15 }
 0xb08   :  { %2611 = vmatmul.mubr.msk.bf16.vlgmr.msra.gmra.mrb[48].mxu0 %vm313_vm2, %v1359_v25  ;;  %2628 = vmatprep.subr.bf16.mxu1 %v2811_v15 }
 0xb09   :  { %2621 = vmatpush3.bf16.msra.mxu0 %v2725_v24  ;;  %2624 = vmatprep.mubr.msk.bf16.mxu0 %vm2812_vm1, %v2811_v15 }
 0xb0a   :  { %2622 = vmatprep.subr.bf16.mxu0 %v2811_v15 }
 0xb0d   :  { %2623 = vmatpush3.bf16.msra.mxu0 %v2726_v26 }
 0xb0e   :  { %2636 = vmatprep.subr.bf16.mxu0 %v2811_v15 }
 0xb10   :  { %2625 = vmatmul.mubr.msk.bf16.vlgmr.msra.gmra.mrb[52].mxu0 %vm62_vm0, %v2939_v34 }
 0xb11   :  { %2637 = vmatpush3.bf16.msra.mxu0 %v2727_v27  ;;  %2640 = vmatprep.mubr.msk.bf16.mxu0 %vm2812_vm1, %v2811_v15 }
 0xb12   :  { %2638 = vmatprep.subr.bf16.mxu0 %v2811_v15 }
 0xb15   :  { %2639 = vmatpush3.bf16.msra.mxu0 %v2728_v28 }
 0xb16   :  { %2650 = vmatprep.subr.bf16.mxu0 %v2811_v15 }
 0xb18   :  { %2641 = vmatmul.mubr.msk.bf16.vlgmr.msra.gmra.mrb[56].mxu0 %vm62_vm0, %v2939_v34 }
 0xb19   :  { %2652 = vmatprep.mubr.msk.bf16.mxu0 %vm2812_vm1, %v2811_v15 }
 0xbd9   :  { %v1400_v30 = vpop.f32.mrb[36].mxu1 }
 0xbda   :  { %v2606_v31 = vpop.f32.mrb[37].mxu1 }
 0xbdb   :  { %v1403_v33 = vpop.f32.mrb[38].mxu1  ;;  %v1446_v35 = vpop.f32.mrb[48].mxu0 }
 0xbdc   :  { %v1452_v37 = vpack.c.bf16 %v1446_v35, %v1400_v30  ;;  %v2607_v38 = vpop.f32.mrb[39].mxu1  ;;  %v2612_v39 = vpop.f32.mrb[49].mxu0 }
 0xbdd   :  { %v1449_v40 = vpop.f32.mrb[50].mxu0 }
 0xbde   :  { %v2613_v41 = vpop.f32.mrb[51].mxu0  ;;  %2617 = vmatmul.mubr.msk.bf16.vlgmr.msra.gmra.mrb[40].mxu1 %vm313_vm2, %v1452_v37 }
 0xbdf   :  { %2629 = vmatpush3.bf16.msra.mxu1 %v2729_v36  ;;  %2632 = vmatprep.mubr.msk.bf16.mxu1 %vm2812_vm1, %v2811_v15 }
 0xbe0   :  { %2630 = vmatprep.subr.bf16.mxu1 %v2811_v15 }
 0xbe3   :  { %v1563_v43 = vpop.f32.mrb[52].mxu0  ;;  %2631 = vmatpush3.bf16.msra.mxu1 %v2730_v42  ;;  %v2352_v42 = vld [vmem:[%s3376_s9 + $0xc] sm:$0xf] }
 0xbe4   :  { %v2626_v44 = vpop.f32.mrb[53].mxu0  ;;  %2644 = vmatprep.subr.bf16.mxu1 %v2811_v15 }
 0xbe5   :  { %v1566_v45 = vpop.f32.mrb[54].mxu0 }
 0xbe6   :  { %v2627_v46 = vpop.f32.mrb[55].mxu0  ;;  %2633 = vmatmul.mubr.msk.bf16.vlgmr.msra.gmra.mrb[44].mxu1 %vm62_vm0, %v2939_v34  ;;  %v2335_v34 = vld [vmem:[%s3374_s7 + $0x3] ss:$0 sm:$0xff] }
 0xbe7   :  { %2646 = vmatprep.mubr.msk.bf16.mxu1 %vm2812_vm1, %v2811_v15 }
 0xbeb   :  { %v1695_v48 = vpop.f32.mrb[56].mxu0 }
 0xbec   :  { %v2642_v49 = vpop.f32.mrb[57].mxu0  ;;  %v1696_v51 = vadd.f32 %v2344_v63, %v1695_v48  ;;  %v1925_v48 = vsel %vm435_vm3, %v2352_v42, 0  ;;  %v2736_v42 = vld [vmem:[%s3382_s15 + $0x18] sm:$0xff]  }
 0xbed   :  { %v1698_v52 = vpop.f32.mrb[58].mxu0 }
 0xbee   :  { %v2643_v53 = vpop.f32.mrb[59].mxu0  ;;  %v1699_v4 = vadd.f32 %v2344_v63, %v1698_v52  ;;  %v1706_v7 = vpack.c.bf16 %v1696_v51, %v1696_v51 }
 0xbf0   :  { %v1707_v10 = vpack.c.bf16 %v1699_v4, %v1699_v4  ;;  %v1830_v12 = vsel %vm435_vm3, %v1706_v7, 0 }
 0xbf2   :  { %v1876_v13 = vsel %vm435_vm3, %v1707_v10, 0 }
 0xcb1   :  { %v1495_v54 = vpop.f32.mrb[40].mxu1 }
 0xcb2   :  { %v3227_v55 = vadd.f32 %v1495_v54, %v3148_v29  ;;  %v2618_v56 = vpop.f32.mrb[41].mxu1 }
 0xcb3   :  { %v1498_v57 = vpop.f32.mrb[42].mxu1 }
 0xcb4   :  { %v3230_v58 = vadd.f32 %v1498_v57, %v3150_v32  ;;  %v2619_v59 = vpop.f32.mrb[43].mxu1  ;;  %v2326_v32 = vld [vmem:[%s3373_s6 + $0x3] ss:$0 sm:$0xff] }
 0xcb5   :  { %v1564_v3 = vadd.f32 %v2326_v32, %v1563_v43  ;;  %v1567_v6 = vadd.f32 %v2326_v32, %v1566_v45 }
 0xcb7   :  { %v1702_v9 = vpack.c.bf16 %v1564_v3, %v1564_v3  ;;  %v1703_v11 = vpack.c.bf16 %v1567_v6, %v1567_v6 }
 0xcb9   :  { %v1629_v60 = vpop.f32.mrb[44].mxu1 }
 0xcba   :  { %v1630_v61 = vadd.f32 %v2335_v34, %v1629_v60  ;;  %v2634_v62 = vpop.f32.mrb[45].mxu1 }
 0xcbb   :  { %v1632_v0 = vpop.f32.mrb[46].mxu1 }
 0xcbc   :  { %v1704_v29 = vpack.c.bf16 %v1630_v61, %v1630_v61  ;;  %v1633_v47 = vadd.f32 %v2335_v34, %v1632_v0  ;;  %v2635_v50 = vpop.f32.mrb[47].mxu1 }
 0xcbd   :  { %v2785_v50 = vld [vmem:[%s3388_s26] sm:$0xff] }
 0xcbe   :  { %v1712_v1 = vsel %vm313_vm2, %v1704_v29, 0  ;;  %v1705_v2 = vpack.c.bf16 %v1633_v47, %v1633_v47  ;;  %v2354_v29 = vld [vmem:[%s3377_s10] ss:$0 sm:$0xff]  ;;  %s2225_s10 = sshll.u32 %s2813_s22, 4  ;;  %s2226_s10 = int_to_ptr.vmem [resolvable:$true] %s2225_s10 }
 0xcbf   :  { %2645 = vmatpush3.bf16.xpose.msra.mxu1 %v1712_v1  ;;  %p2792_p1 = scmp.lt.s32.totalorder %s2226_s10, %s2226_s10 }
 0xcc0   :  { %v1758_v5 = vsel %vm313_vm2, %v1705_v2, 0  ;;  %2656 = vmatprep.subr.bf16.mxu1 %v2811_v15 }
 0xcc1   :  { %2651 = vmatpush3.bf16.xpose.msra.mxu0 %v1758_v5 }
 0xcc2   :  { %2662 = vmatprep.subr.bf16.mxu0 %v2811_v15 }
 0xcc6   :  { %2647 = vmatmul.mubr.msk.bf16.vlgmr.msra.gmra.mrb[48].mxu1 %vm313_vm2, %v1702_v9 }
 0xcc7   :  { %2657 = vmatpush3.bf16.msra.mxu1 %v1830_v12  ;;  %2658 = vmatprep.mubr.msk.bf16.mxu1 %vm2812_vm1, %v2811_v15 }
 0xcc8   :  { %2653 = vmatmul.mubr.msk.bf16.vlgmr.msra.gmra.mrb[60].mxu0 %vm313_vm2, %v1703_v11  ;;  %2668 = vmatprep.subr.bf16.mxu1 %v2811_v15 }
 0xcc9   :  { %2663 = vmatpush3.bf16.msra.mxu0 %v1876_v13  ;;  %2664 = vmatprep.mubr.msk.bf16.mxu0 %vm2812_vm1, %v2811_v15 }
 0xcca   :  { %2674 = vmatprep.subr.bf16.mxu0 %v2811_v15 }
 0xd99   :  { %v1748_v14 = vpop.f32.mrb[48].mxu1 }
 0xd9a   :  { %v1800_v16 = vsel %vm2989_vm4, %v1748_v14, -1e+30  ;;  %v2648_v17 = vpop.f32.mrb[49].mxu1 }
 0xd9b   :  { %v1751_v18 = vpop.f32.mrb[50].mxu1  ;;  %v1794_v19 = vpop.f32.mrb[60].mxu0  ;;  %v1802_v20 = vsel %vm313_vm2, %v1800_v16, -inf }
 0xd9c   :  { %v1801_v21 = vsel %vm2989_vm4, %v1794_v19, -1e+30  ;;  %1803 = vmax.xlane.f32.xlu0 %v1802_v20  ;;  %v2649_v22 = vpop.f32.mrb[51].mxu1  ;;  %v2654_v23 = vpop.f32.mrb[61].mxu0  ;;  %v2731_v18 = vld [vmem:[%s3380_s13] sm:$0xff]   ;;  %v2732_v19 = vld [vmem:[%s3380_s13 + $0x8] sm:$0xff]  }
 0xd9d   :  { %v1797_v24 = vpop.f32.mrb[62].mxu0  ;;  %v1805_v25 = vsel %vm313_vm2, %v1801_v21, -inf  ;;  %v2733_v20 = vld [vmem:[%s3382_s15] sm:$0xff]  }
 0xd9e   :  { %1806 = vmax.xlane.f32.xlu1 %v1805_v25  ;;  %v2655_v26 = vpop.f32.mrb[63].mxu0 }
 0xe29   :  { %v1804_v27 = vpop.xlane.xlu0 %1803 }
 0xe2a   :  { %v1808_v28 = vsub.f32 %v1800_v16, %v1804_v27 }
 0xe2b   :  { %v1807_v30 = vpop.xlane.xlu1 %1806 }
 0xe2c   :  { %v1810_v31 = vmul.f32 1.442695, %v1808_v28  ;;  %v1809_v33 = vsub.f32 %v1801_v21, %v1807_v30  ;;  %v2734_v21 = vld [vmem:[%s3382_s15 + $0x8] sm:$0xff]   ;;  %v2355_v30 = vld [vmem:[%s3378_s11] ss:$0 sm:$0xff] }
 0xe2e   :  { %2769 = vpow2.f32 %v1810_v31  ;;  %v1812_v35 = vmul.f32 1.442695, %v1809_v33 }
 0xe30   :  { %2771 = vpow2.f32 %v1812_v35 }
 0xe38   :  { %v2770_v36 = vpop.eup %2769 }
 0xe39   :  { %v1814_v8 = vsel %vm313_vm2, %v2770_v36, 0.0 }
 0xe3a   :  { %v2772_v37 = vpop.eup %2771  ;;  %1815 = vadd.xlane.f32.xlu0 %v1814_v8  ;;  %v2356_v8 = vld [vmem:[%s3379_s12] ss:$0 sm:$0xff] }
 0xe3b   :  { %v1817_v38 = vsel %vm313_vm2, %v2772_v37, 0.0 }
 0xe3c   :  { %1818 = vadd.xlane.f32.xlu1 %v1817_v38 }
 0xec7   :  { %v1816_v39 = vpop.xlane.xlu0 %1815 }
 0xec8   :  { %2773 = vrcp.f32 %v1816_v39 }
 0xec9   :  { %v1819_v40 = vpop.xlane.xlu1 %1818 }
 0xeca   :  { %2775 = vrcp.f32 %v1819_v40 }
 0xed2   :  { %v2774_v41 = vpop.eup %2773 }
 0xed3   :  { %v1822_v43 = vmul.f32 %v2774_v41, %v2770_v36  ;;  %v2735_v41 = vld [vmem:[%s3382_s15 + $0x10] sm:$0xff]  }
 0xed4   :  { %v2776_v44 = vpop.eup %2775 }
 0xed5   :  { %v1823_v45 = vmul.f32 %v2776_v44, %v2772_v37  ;;  %v1824_v46 = vpack.c.bf16 %v1822_v43, %v1822_v43  ;;  %v2737_v43 = vld [vmem:[%s3382_s15 + $0x20] sm:$0xff]   ;;  %v2738_v44 = vld [vmem:[%s3382_s15 + $0x28] sm:$0xff]  }
 0xed7   :  { %2659 = vmatmul.mubr.msk.bf16.vlgmr.msra.gmra.mrb[52].mxu1 %vm313_vm2, %v1824_v46  ;;  %v1825_v49 = vpack.c.bf16 %v1823_v45, %v1823_v45  ;;  %v2739_v45 = vld [vmem:[%s3382_s15 + $0x30] sm:$0xff]   ;;  %v2740_v46 = vld [vmem:[%s3382_s15 + $0x38] sm:$0xff]  }
 0xed8   :  { %2669 = vmatpush3.bf16.msra.mxu1 %v1925_v48  ;;  %2670 = vmatprep.mubr.msk.bf16.mxu1 %vm2812_vm1, %v2811_v15  ;;  %v2357_v48 = vld [vmem:[%s3381_s14] ss:$0 sm:$0xff] }
 0xed9   :  { %2665 = vmatmul.mubr.msk.bf16.vlgmr.msra.gmra.mrb[64].mxu0 %vm313_vm2, %v1825_v49  ;;  %2682 = vmatprep.subr.bf16.mxu1 %v2811_v15 }
 0xeda   :  { %2678 = vmatprep.mubr.msk.bf16.mxu0 %vm2812_vm1, %v2811_v15  ;;  %2675 = vmatpush3.bf16.msra.mxu0 %v2731_v18 }
 0xedb   :  { %2676 = vmatprep.subr.bf16.mxu0 %v2811_v15 }
 0xede   :  { %2677 = vmatpush3.bf16.msra.mxu0 %v2732_v19 }
 0xfaa   :  { %v1866_v52 = vpop.f32.mrb[52].mxu1 }
 0xfab   :  { %v2660_v53 = vpop.f32.mrb[53].mxu1 }
 0xfac   :  { %v1869_v54 = vpop.f32.mrb[54].mxu1  ;;  %v1912_v56 = vpop.f32.mrb[64].mxu0 }
 0xfad   :  { %v1918_v57 = vpack.c.bf16 %v1912_v56, %v1866_v52  ;;  %v2661_v59 = vpop.f32.mrb[55].mxu1  ;;  %v2666_v34 = vpop.f32.mrb[65].mxu0 }
 0xfae   :  { %v1915_v60 = vpop.f32.mrb[66].mxu0 }
 0xfaf   :  { %v2667_v61 = vpop.f32.mrb[67].mxu0  ;;  %2671 = vmatmul.mubr.msk.bf16.vlgmr.msra.gmra.mrb[56].mxu1 %vm313_vm2, %v1918_v57 }
 0xfb0   :  { %2698 = vmatprep.mubr.msk.bf16.mxu1 %vm2812_vm1, %v2811_v15  ;;  %2683 = vmatpush3.bf16.msra.mxu1 %v2733_v20 }
 0xfb1   :  { %2684 = vmatprep.subr.bf16.mxu1 %v2811_v15 }
 0xfb4   :  { %2685 = vmatpush3.bf16.msra.mxu1 %v2734_v21 }
 0xfb5   :  { %2686 = vmatprep.subr.bf16.mxu1 %v2811_v15 }
 0xfb8   :  { %2687 = vmatpush3.bf16.msra.mxu1 %v2735_v41 }
 0xfb9   :  { %2688 = vmatprep.subr.bf16.mxu1 %v2811_v15 }
 0xfbc   :  { %2689 = vmatpush3.bf16.msra.mxu1 %v2736_v42 }
 0xfbd   :  { %2690 = vmatprep.subr.bf16.mxu1 %v2811_v15 }
 0xfc0   :  { %2691 = vmatpush3.bf16.msra.mxu1 %v2737_v43 }
 0xfc1   :  { %2692 = vmatprep.subr.bf16.mxu1 %v2811_v15 }
 0xfc4   :  { %2693 = vmatpush3.bf16.msra.mxu1 %v2738_v44 }
 0xfc5   :  { %2694 = vmatprep.subr.bf16.mxu1 %v2811_v15 }
 0xfc8   :  { %2695 = vmatpush3.bf16.msra.mxu1 %v2739_v45 }
 0xfc9   :  { %2696 = vmatprep.subr.bf16.mxu1 %v2811_v15 }
 0xfcc   :  { %2697 = vmatpush3.bf16.msra.mxu1 %v2740_v46 }
0x1082   :  { %v1961_v62 = vpop.f32.mrb[56].mxu1 }
0x1083   :  { %v1968_v63 = vadd.f32 %v1961_v62, %v3227_v55  ;;  %v2672_v0 = vpop.f32.mrb[57].mxu1  ;;  %v2786_v55 = vld [vmem:[%s3388_s26 + $0x8] sm:$0xff]  ;;  %s2787_s26 = scalar_lea.vmem %s2226_s10, 256 }
0x1084   :  { %v1964_v47 = vpop.f32.mrb[58].mxu1  ;;  %p2788_p0 = scmp.ne.s32.totalorder %s2226_s10, %s2787_s26  ;;  %p2793_p2 = scmp.lt.s32.totalorder %s2787_s26, %s2787_s26 }
0x1085   :  { %v1970_v32 = vadd.f32 %v2785_v50, %v1968_v63  ;;  %v1969_v51 = vadd.f32 %v1964_v47, %v3230_v58  ;;  %v2673_v1 = vpop.f32.mrb[59].mxu1 }
0x1086   :  { %p2794_p3 = por %p2793_p2, %p2792_p1 }
0x1087   :  { %v3285_v2 = vadd.f32 %v2354_v29, %v1970_v32  ;;  %v1971_v3 = vadd.f32 %v2786_v55, %v1969_v51  ;;  %v2361_v32 = vld [vmem:[%s3383_s16] ss:$0 sm:$0xff] }
0x1088   :  { %p2795_p4 = pnand %p2794_p3, %p2788_p0 }
0x1089   :  { %v3290_v4 = vadd.f32 %v2354_v29, %v1971_v3  ;;  %v1983_v5 = vsel %vm62_vm0, %v3285_v2, 0.0 }
0x108a   :  { %1984 = vadd.xlane.f32.xlu0 %v1983_v5 }
0x108b   :  { %v1986_v6 = vsel %vm62_vm0, %v3290_v4, 0.0 }
0x108c   :  { %1987 = vadd.xlane.f32.xlu1 %v1986_v6 }
0x1117   :  { %v1985_v7 = vpop.xlane.xlu0 %1984 }
0x1118   :  { %v1989_v58 = vmul.f32 0.03125, %v1985_v7 }
0x1119   :  { %v1988_v9 = vpop.xlane.xlu1 %1987 }
0x111a   :  { %v1991_v10 = vsub.f32 %v3285_v2, %v1989_v58  ;;  %v1990_v11 = vmul.f32 0.03125, %v1988_v9 }
0x111c   :  { %v1992_v12 = vsub.f32 %v3290_v4, %v1990_v11  ;;  %v1993_v13 = vmul.f32 %v1991_v10, %v1991_v10 }
0x111e   :  { %v1995_v14 = vsel %vm62_vm0, %v1993_v13, 0.0  ;;  %v1994_v16 = vmul.f32 %v1992_v12, %v1992_v12 }
0x111f   :  { %1996 = vadd.xlane.f32.xlu0 %v1995_v14 }
0x1120   :  { %v1998_v17 = vsel %vm62_vm0, %v1994_v16, 0.0 }
0x1121   :  { %1999 = vadd.xlane.f32.xlu1 %v1998_v17 }
0x11ac   :  { %v1997_v22 = vpop.xlane.xlu0 %1996 }
0x11ad   :  { %v2001_v23 = vmul.f32 0.03125, %v1997_v22 }
0x11ae   :  { %v2000_v24 = vpop.xlane.xlu1 %1999 }
0x11af   :  { %v2003_v25 = vadd.f32 1e-05, %v2001_v23  ;;  %v2002_v26 = vmul.f32 0.03125, %v2000_v24 }
0x11b1   :  { %2777 = vrsqrt.f32 %v2003_v25  ;;  %v2004_v27 = vadd.f32 1e-05, %v2002_v26 }
0x11b3   :  { %2779 = vrsqrt.f32 %v2004_v27 }
0x11bb   :  { %v2778_v28 = vpop.eup %2777 }
0x11bc   :  { %v2007_v31 = vmul.f32 %v2778_v28, %v1991_v10 }
0x11bd   :  { %v2780_v33 = vpop.eup %2779 }
0x11be   :  { %v2015_v35 = vmul.f32 %v2355_v30, %v2007_v31  ;;  %v2008_v36 = vmul.f32 %v2780_v33, %v1992_v12 }
0x11c0   :  { %v2016_v37 = vmul.f32 %v2355_v30, %v2008_v36  ;;  %v2023_v38 = vadd.f32 %v2356_v8, %v2015_v35 }
0x11c2   :  { %v2024_v39 = vadd.f32 %v2356_v8, %v2016_v37 }
0x11c4   :  { %v2025_v40 = vpack.c.bf16 %v2024_v39, %v2023_v38 }
0x11c6   :  { %2679 = vmatmul.mubr.msk.bf16.vlgmr.msra.gmra.mrb[68].mxu0 %vm62_vm0, %v2025_v40 }
0x1299   :  { %v2086_v49 = vpop.f32.mrb[68].mxu0 }
0x129a   :  { %v2087_v52 = vadd.f32 %v2357_v48, %v2086_v49  ;;  %v2680_v53 = vpop.f32.mrb[69].mxu0 }
0x129b   :  { %v2089_v54 = vpop.f32.mrb[70].mxu0 }
0x129c   :  { %v2095_v56 = vmul.f32 0.70710677, %v2087_v52  ;;  %v2090_v57 = vadd.f32 %v2357_v48, %v2089_v54  ;;  %v2681_v59 = vpop.f32.mrb[71].mxu0  ;;  %v2093_v62 = vmul.f32 0.5, %v2087_v52 }
0x129e   :  { %2781 = verf.f32 %v2095_v56  ;;  %v2096_v34 = vmul.f32 0.70710677, %v2090_v57  ;;  %v2094_v63 = vmul.f32 0.5, %v2090_v57 }
0x12a0   :  { %2783 = verf.f32 %v2096_v34 }
0x12a8   :  { %v2782_v15 = vpop.eup %2781 }
0x12a9   :  { %v2099_v60 = vadd.f32 1.0, %v2782_v15 }
0x12aa   :  { %v2784_v61 = vpop.eup %2783 }
0x12ab   :  { %v2100_v0 = vadd.f32 1.0, %v2784_v61  ;;  %v2101_v29 = vmul.f32 %v2099_v60, %v2093_v62 }
0x12ad   :  { %v2102_v47 = vmul.f32 %v2100_v0, %v2094_v63 }
0x12af   :  { %v2103_v50 = vpack.c.bf16 %v2102_v47, %v2101_v29 }
0x12b1   :  { %2699 = vmatmul.mubr.bf16.vlgmr.msra.gmra.mrb[60].mxu1 %v2103_v50 }
0x1384   :  { %v2209_v51 = vpop.f32.mrb[60].mxu1 }
0x1385   :  { %v2210_v1 = vadd.f32 %v2361_v32, %v2209_v51  ;;  %v2700_v55 = vpop.f32.mrb[61].mxu1 }
0x1386   :  { %v2212_v3 = vpop.f32.mrb[62].mxu1 }
0x1387   :  { %v2216_v5 = vadd.f32 %v2210_v1, %v3285_v2  ;;  %v2213_v6 = vadd.f32 %v2361_v32, %v2212_v3  ;;  %v2701_v7 = vpop.f32.mrb[63].mxu1 }
0x1389   :  { %2218 = vst.msk [vmem:[#allocation2] sm:$0xff] %vm62_vm0, %v2216_v5  ;;  %v2217_v58 = vadd.f32 %v2213_v6, %v3290_v4 }
0x138b   :  { %2219 = vst.msk [vmem:[#allocation2 + $0x8] sm:$0xff] %vm62_vm0, %v2217_v58 }
0x138c   :  { %2798 = shalt.err (!%p2795_p4)
}
0x138d   :  { %s2799_s24 = scalar_lea.hbm %s3384_s17, 256 }
0x138e   :  { %p2800_p5 = scmp.ne.s32.totalorder %s3384_s17, %s2799_s24  ;;  %p2803_p6 = scmp.lt.u32.totalorder %s2799_s24, %s3384_s17 }
0x1390   :  { %p2805_p7 = pnand %p2803_p6, %p2800_p5 }
0x1392   :  { %2808 = shalt.err (!%p2805_p7)
}
0x1393   :  { %s2814_s13 = smov 128   ;;  %s2815_s2 = smov 8  }
0x1394   :  { %2231 = dma.vmem_to_hbm [thread:$0]  %s2226_s10, 256, %s3384_s17, [#allocation3], %s2814_s13, %s2814_s13, %s2815_s2  }
0x1395   :  { %2809 = dma.done.wait [#allocation3], 256  }
0x1396   :  { %2810 = vsyncadd [#allocation3], 4294967040 }
0x1397   :  { %2235 = vsyncpa [#allocation3], 1 }

</bundles_post_ra>
